<compile_context>
chip_gen: v7x
topology: tpu7x:2x2x1
jax: 0.10.0
libtpu: 0.0.40
codegen_flags: <defaults>
</compile_context>

<pallas_src>
import math
import jax
import jax.numpy as jnp
from jax.experimental import pallas as pl
from jax.experimental.pallas import tpu as pltpu

# ----------------------------- model config (small, synthetic) -----------------------------
VOCAB = 100
HIDDEN = 32
N_HEADS = 2
HEAD_DIM = HIDDEN // N_HEADS
N_LAYERS = 2
INTERMEDIATE = 64
MAX_POS = 16
N_CLASSES = 3
OUT_PAD = 128            # lane-dense padded width of the classifier head output
LN_EPS = 1e-12


# ----------------------------------- fused Pallas kernel -----------------------------------

def _make_fused_kernel(batch, seq):
    tokens = batch * seq
    scale = 1.0 / math.sqrt(HEAD_DIM)

    def kernel(emb_ref, mask_ref, eg_ref, eb_ref,
               wqkv_ref, bqkv_ref, wo_ref, bo_ref, g1_ref, b1_ref,
               wi_ref, bi_ref, wf_ref, bf_ref, g2_ref, b2_ref,
               pw_ref, pb_ref, ow_ref, ob_ref,
               logits_ref):

        def layer_norm(x, g, b):
            mu = jnp.mean(x, axis=-1, keepdims=True)
            var = jnp.mean(jnp.square(x - mu), axis=-1, keepdims=True)
            return (x - mu) * jax.lax.rsqrt(var + LN_EPS) * g + b

        def mm(x, w):
            # bf16 MXU inputs, f32 accumulation (elementwise math stays f32 for v5e).
            return jnp.dot(x.astype(jnp.bfloat16), w, preferred_element_type=jnp.float32)

        x = layer_norm(emb_ref[...], eg_ref[...], eb_ref[...])          # (T, H) f32
        mask = mask_ref[...]                                             # (B, 1, S) additive

        for l in range(N_LAYERS):
            # ---------------- self-attention (fused QKV, all batches per head) ----------------
            wo = wo_ref[l]                                               # (H, H) bf16
            qkv = mm(x, wqkv_ref[l]) + bqkv_ref[l]                       # (T, 3H) f32
            qkv3 = qkv.reshape(batch, seq, 3 * HIDDEN)                   # (B, S, 3H)
            attn = None
            for h in range(N_HEADS):                                     # static 2-way unroll
                q = qkv3[:, :, h * HEAD_DIM:(h + 1) * HEAD_DIM]
                k = qkv3[:, :, HIDDEN + h * HEAD_DIM:HIDDEN + (h + 1) * HEAD_DIM]
                v = qkv3[:, :, 2 * HIDDEN + h * HEAD_DIM:2 * HIDDEN + (h + 1) * HEAD_DIM]
                s = jnp.einsum("bqd,bkd->bqk",
                               q.astype(jnp.bfloat16), k.astype(jnp.bfloat16),
                               preferred_element_type=jnp.float32) * scale + mask
                s = s - jnp.max(s, axis=-1, keepdims=True)
                p = jnp.exp(s)
                p = p / jnp.sum(p, axis=-1, keepdims=True)
                ctx = jnp.einsum("bqk,bkd->bqd",
                                 p.astype(jnp.bfloat16), v.astype(jnp.bfloat16),
                                 preferred_element_type=jnp.float32)     # (B, S, D) f32
                # per-head slice of the output projection == concat-then-project
                part = mm(ctx.reshape(tokens, HEAD_DIM),
                          wo[h * HEAD_DIM:(h + 1) * HEAD_DIM, :])        # (T, H)
                attn = part if attn is None else attn + part
            attn = attn + bo_ref[l]
            x = layer_norm(x + attn, g1_ref[l], b1_ref[l])

            # -------------------------------- feed-forward -----------------------------------
            # TODO(synk): BERT uses erf-based GELU; tanh approximation used here.
            inter = jax.nn.gelu(mm(x, wi_ref[l]) + bi_ref[l], approximate=True)
            ffn = mm(inter, wf_ref[l]) + bf_ref[l]
            x = layer_norm(x + ffn, g2_ref[l], b2_ref[l])

        # ---------------------------- pooler + classifier head -------------------------------
        # Applied to every token (trivial extra flops at this size) so the single output
        # store is a dense, vreg-aligned (tokens, 128) slab; the wrapper picks the [CLS]
        # row and the first n_classes lanes.
        pooled = jnp.tanh(mm(x, pw_ref[...]) + pb_ref[...])              # (T, H)
        # nn.Dropout(p=0.3): identity at inference (eval mode).
        logits_ref[...] = (mm(pooled, ow_ref[...]) + ob_ref[...]).astype(logits_ref.dtype)

    return kernel


# --------------------------------- parameter initialization --------------------------------

def init_params(key):
    keys = iter(jax.random.split(key, 3 + 4 * N_LAYERS + 2))

    def dense(k, fi, fo):
        return (jax.random.normal(k, (fi, fo), jnp.float32) * 0.02).astype(jnp.bfloat16)

    word_emb = jax.random.normal(next(keys), (VOCAB, HIDDEN), jnp.float32) * 0.02
    pos_emb = jax.random.normal(next(keys), (MAX_POS, HIDDEN), jnp.float32) * 0.02
    type_emb = jax.random.normal(next(keys), (2, HIDDEN), jnp.float32) * 0.02

    wqkv, wo, wi, wf = [], [], [], []
    for _ in range(N_LAYERS):
        wqkv.append(dense(next(keys), HIDDEN, 3 * HIDDEN))   # fused Q/K/V projection
        wo.append(dense(next(keys), HIDDEN, HIDDEN))
        wi.append(dense(next(keys), HIDDEN, INTERMEDIATE))
        wf.append(dense(next(keys), INTERMEDIATE, HIDDEN))

    pool_w = dense(next(keys), HIDDEN, HIDDEN)
    out_w = jax.random.normal(next(keys), (HIDDEN, N_CLASSES), jnp.float32) * 0.02
    out_w_pad = jnp.zeros((HIDDEN, OUT_PAD), jnp.float32).at[:, :N_CLASSES].set(out_w)

    L = N_LAYERS
    return {
        "word_emb": word_emb, "pos_emb": pos_emb, "type_emb": type_emb,
        "emb_ln_g": jnp.ones((1, HIDDEN), jnp.float32),
        "emb_ln_b": jnp.zeros((1, HIDDEN), jnp.float32),
        "wqkv": jnp.stack(wqkv), "bqkv": jnp.zeros((L, 1, 3 * HIDDEN), jnp.float32),
        "wo": jnp.stack(wo), "bo": jnp.zeros((L, 1, HIDDEN), jnp.float32),
        "ln1_g": jnp.ones((L, 1, HIDDEN), jnp.float32),
        "ln1_b": jnp.zeros((L, 1, HIDDEN), jnp.float32),
        "wi": jnp.stack(wi), "bi": jnp.zeros((L, 1, INTERMEDIATE), jnp.float32),
        "wf": jnp.stack(wf), "bf": jnp.zeros((L, 1, HIDDEN), jnp.float32),
        "ln2_g": jnp.ones((L, 1, HIDDEN), jnp.float32),
        "ln2_b": jnp.zeros((L, 1, HIDDEN), jnp.float32),
        "pool_w": pool_w, "pool_b": jnp.zeros((1, HIDDEN), jnp.float32),
        "out_w": out_w_pad.astype(jnp.bfloat16),          # lane-padded classifier weight
        "out_b": jnp.zeros((1, OUT_PAD), jnp.float32),
    }


# ------------------------------------- forward pass ----------------------------------------

def sentiment_classifier_forward(params, input_ids, attention_mask):
    p = params
    batch, seq = input_ids.shape

    # Embedding gathers are XLA glue; everything downstream runs in one fused Pallas kernel.
    we = jnp.take(p["word_emb"], input_ids, axis=0)                      # (B, S, H)
    pe = p["pos_emb"][:seq][None, :, :]                                  # (1, S, H)
    te = p["type_emb"][0][None, None, :]                                 # token_type_ids == 0
    emb = (we + pe + te).reshape(batch * seq, HIDDEN)

    ext_mask = ((1.0 - attention_mask.astype(jnp.float32)) * -10000.0
                ).reshape(batch, 1, seq)                                 # additive key mask

    vmem = pl.BlockSpec(memory_space=pltpu.MemorySpace.VMEM)
    args = (emb, ext_mask, p["emb_ln_g"], p["emb_ln_b"],
            p["wqkv"], p["bqkv"], p["wo"], p["bo"], p["ln1_g"], p["ln1_b"],
            p["wi"], p["bi"], p["wf"], p["bf"], p["ln2_g"], p["ln2_b"],
            p["pool_w"], p["pool_b"], p["out_w"], p["out_b"])

    logits_all = pl.pallas_call(
        _make_fused_kernel(batch, seq),
        out_shape=jax.ShapeDtypeStruct((batch * seq, OUT_PAD), jnp.float32),
        in_specs=[vmem] * len(args),
        out_specs=vmem,
    )(*args)

    # [CLS] (first token) row, first n_classes lanes of the lane-padded slab.
    return logits_all.reshape(batch, seq, OUT_PAD)[:, 0, :N_CLASSES]


# ----------------------------------------- main ---------------------------------------------

if __name__ == "__main__":
    key = jax.random.PRNGKey(0)
    k_params, k_ids = jax.random.split(key)

    B, S = 2, 8
    params = init_params(k_params)
    input_ids = jax.random.randint(k_ids, (B, S), 0, VOCAB, dtype=jnp.int32)
    attention_mask = jnp.array(
        [[1, 1, 1, 1, 1, 1, 1, 1],
         [1, 1, 1, 1, 1, 1, 0, 0]], dtype=jnp.int32)

    fwd = jax.jit(sentiment_classifier_forward)
    logits = fwd(params, input_ids, attention_mask)
    jax.block_until_ready(logits)
    assert logits.shape == (B, N_CLASSES) and logits.dtype == jnp.float32
    print("KERNEL_OK")
</pallas_src>

<mosaic_0001>
module attributes {stable_mosaic.version = 11 : i64} {
  func.func @kernel(%arg0: memref<16x32xf32, #tpu.memory_space<vmem>>, %arg1: memref<2x1x8xf32, #tpu.memory_space<vmem>>, %arg2: memref<1x32xf32, #tpu.memory_space<vmem>>, %arg3: memref<1x32xf32, #tpu.memory_space<vmem>>, %arg4: memref<2x32x96xbf16, #tpu.memory_space<vmem>>, %arg5: memref<2x1x96xf32, #tpu.memory_space<vmem>>, %arg6: memref<2x32x32xbf16, #tpu.memory_space<vmem>>, %arg7: memref<2x1x32xf32, #tpu.memory_space<vmem>>, %arg8: memref<2x1x32xf32, #tpu.memory_space<vmem>>, %arg9: memref<2x1x32xf32, #tpu.memory_space<vmem>>, %arg10: memref<2x32x64xbf16, #tpu.memory_space<vmem>>, %arg11: memref<2x1x64xf32, #tpu.memory_space<vmem>>, %arg12: memref<2x64x32xbf16, #tpu.memory_space<vmem>>, %arg13: memref<2x1x32xf32, #tpu.memory_space<vmem>>, %arg14: memref<2x1x32xf32, #tpu.memory_space<vmem>>, %arg15: memref<2x1x32xf32, #tpu.memory_space<vmem>>, %arg16: memref<32x32xbf16, #tpu.memory_space<vmem>>, %arg17: memref<1x32xf32, #tpu.memory_space<vmem>>, %arg18: memref<32x128xbf16, #tpu.memory_space<vmem>>, %arg19: memref<1x128xf32, #tpu.memory_space<vmem>>, %arg20: memref<16x128xf32, #tpu.memory_space<vmem>>) attributes {dimension_semantics = [], scalar_prefetch = 0 : i64, scratch_operands = 0 : i64, tpu.core_type = #tpu.core_type<tc>} {
    %c0 = arith.constant 0 : index
    %c0_0 = arith.constant 0 : index
    %0 = vector.load %arg0[%c0, %c0_0] : memref<16x32xf32, #tpu.memory_space<vmem>>, vector<16x32xf32>
    %c0_1 = arith.constant 0 : index
    %c0_2 = arith.constant 0 : index
    %1 = vector.load %arg2[%c0_1, %c0_2] : memref<1x32xf32, #tpu.memory_space<vmem>>, vector<1x32xf32>
    %c0_3 = arith.constant 0 : index
    %c0_4 = arith.constant 0 : index
    %2 = vector.load %arg3[%c0_3, %c0_4] : memref<1x32xf32, #tpu.memory_space<vmem>>, vector<1x32xf32>
    %cst = arith.constant dense<0.000000e+00> : vector<16xf32>
    %3 = vector.multi_reduction <add>, %0, %cst [1] : vector<16x32xf32> to vector<16xf32>
    %4 = vector.shape_cast %3 : vector<16xf32> to vector<16x1xf32>
    %cst_5 = arith.constant 3.200000e+01 : f32
    %5 = vector.broadcast %cst_5 : f32 to vector<16x1xf32>
    %6 = arith.divf %4, %5 : vector<16x1xf32>
    %7 = vector.broadcast %6 : vector<16x1xf32> to vector<16x32xf32>
    %8 = arith.subf %0, %7 : vector<16x32xf32>
    %9 = arith.mulf %8, %8 : vector<16x32xf32>
    %cst_6 = arith.constant dense<0.000000e+00> : vector<16xf32>
    %10 = vector.multi_reduction <add>, %9, %cst_6 [1] : vector<16x32xf32> to vector<16xf32>
    %11 = vector.shape_cast %10 : vector<16xf32> to vector<16x1xf32>
    %cst_7 = arith.constant 3.200000e+01 : f32
    %12 = vector.broadcast %cst_7 : f32 to vector<16x1xf32>
    %13 = arith.divf %11, %12 : vector<16x1xf32>
    %14 = vector.broadcast %6 : vector<16x1xf32> to vector<16x32xf32>
    %15 = arith.subf %0, %14 : vector<16x32xf32>
    %cst_8 = arith.constant 9.99999996E-13 : f32
    %16 = vector.broadcast %cst_8 : f32 to vector<16x1xf32>
    %17 = arith.addf %13, %16 : vector<16x1xf32>
    %18 = math.rsqrt %17 : vector<16x1xf32>
    %19 = vector.broadcast %18 : vector<16x1xf32> to vector<16x32xf32>
    %20 = arith.mulf %15, %19 : vector<16x32xf32>
    %21 = vector.broadcast %1 : vector<1x32xf32> to vector<16x32xf32>
    %22 = arith.mulf %20, %21 : vector<16x32xf32>
    %23 = vector.broadcast %2 : vector<1x32xf32> to vector<16x32xf32>
    %24 = arith.addf %22, %23 : vector<16x32xf32>
    %c0_9 = arith.constant 0 : index
    %c0_10 = arith.constant 0 : index
    %c0_11 = arith.constant 0 : index
    %25 = vector.load %arg1[%c0_9, %c0_10, %c0_11] : memref<2x1x8xf32, #tpu.memory_space<vmem>>, vector<2x1x8xf32>
    %c0_12 = arith.constant 0 : index
    %c0_13 = arith.constant 0 : index
    %c0_14 = arith.constant 0 : index
    %26 = vector.load %arg6[%c0_12, %c0_13, %c0_14] : memref<2x32x32xbf16, #tpu.memory_space<vmem>>, vector<1x32x32xbf16>
    %27 = vector.shape_cast %26 : vector<1x32x32xbf16> to vector<32x32xbf16>
    %c0_15 = arith.constant 0 : index
    %c0_16 = arith.constant 0 : index
    %c0_17 = arith.constant 0 : index
    %28 = vector.load %arg4[%c0_15, %c0_16, %c0_17] : memref<2x32x96xbf16, #tpu.memory_space<vmem>>, vector<1x32x96xbf16>
    %29 = vector.shape_cast %28 : vector<1x32x96xbf16> to vector<32x96xbf16>
    %30 = arith.truncf %24 : vector<16x32xf32> to vector<16x32xbf16>
    %cst_18 = arith.constant dense<0.000000e+00> : vector<16x96xf32>
    %31 = tpu.matmul %30, %29, %cst_18 {dimension_numbers = #tpu.dot_dimension_numbers<[1], [0], [0], [1], [0, 0, 1, 1], [], []>} : vector<16x32xbf16>, vector<32x96xbf16>, vector<16x96xf32> -> vector<16x96xf32>
    %c0_19 = arith.constant 0 : index
    %c0_20 = arith.constant 0 : index
    %c0_21 = arith.constant 0 : index
    %32 = vector.load %arg5[%c0_19, %c0_20, %c0_21] : memref<2x1x96xf32, #tpu.memory_space<vmem>>, vector<1x1x96xf32>
    %33 = vector.shape_cast %32 : vector<1x1x96xf32> to vector<1x96xf32>
    %34 = vector.broadcast %33 : vector<1x96xf32> to vector<16x96xf32>
    %35 = arith.addf %31, %34 : vector<16x96xf32>
    %36 = vector.shape_cast %35 : vector<16x96xf32> to vector<2x8x96xf32>
    %37 = vector.extract_strided_slice %36 {offsets = [0, 0, 0], sizes = [2, 8, 16], strides = [1, 1, 1]} : vector<2x8x96xf32> to vector<2x8x16xf32>
    %38 = vector.extract_strided_slice %36 {offsets = [0, 0, 32], sizes = [2, 8, 16], strides = [1, 1, 1]} : vector<2x8x96xf32> to vector<2x8x16xf32>
    %39 = vector.extract_strided_slice %36 {offsets = [0, 0, 64], sizes = [2, 8, 16], strides = [1, 1, 1]} : vector<2x8x96xf32> to vector<2x8x16xf32>
    %40 = arith.truncf %37 : vector<2x8x16xf32> to vector<2x8x16xbf16>
    %41 = arith.truncf %38 : vector<2x8x16xf32> to vector<2x8x16xbf16>
    "tpu.trace_start"() <{level = 10 : i32, message = "bqd,bkd->bqk"}> : () -> ()
    %cst_22 = arith.constant dense<0.000000e+00> : vector<2x8x8xf32>
    %42 = tpu.matmul %40, %41, %cst_22 {dimension_numbers = #tpu.dot_dimension_numbers<[2], [2], [1], [1], [0, 0, 0, 1, 1, 1], [0], [0]>} : vector<2x8x16xbf16>, vector<2x8x16xbf16>, vector<2x8x8xf32> -> vector<2x8x8xf32>
    "tpu.trace_stop"() : () -> ()
    %cst_23 = arith.constant 2.500000e-01 : f32
    %43 = vector.broadcast %cst_23 : f32 to vector<2x8x8xf32>
    %44 = arith.mulf %42, %43 : vector<2x8x8xf32>
    %45 = vector.broadcast %25 : vector<2x1x8xf32> to vector<2x8x8xf32>
    %46 = arith.addf %44, %45 : vector<2x8x8xf32>
    %cst_24 = arith.constant dense<0xFF800000> : vector<2x8xf32>
    %47 = vector.multi_reduction <maximumf>, %46, %cst_24 [2] : vector<2x8x8xf32> to vector<2x8xf32>
    %48 = vector.shape_cast %47 : vector<2x8xf32> to vector<2x8x1xf32>
    %49 = vector.broadcast %48 : vector<2x8x1xf32> to vector<2x8x8xf32>
    %50 = arith.subf %46, %49 : vector<2x8x8xf32>
    %51 = math.exp %50 : vector<2x8x8xf32>
    %cst_25 = arith.constant dense<0.000000e+00> : vector<2x8xf32>
    %52 = vector.multi_reduction <add>, %51, %cst_25 [2] : vector<2x8x8xf32> to vector<2x8xf32>
    %53 = vector.shape_cast %52 : vector<2x8xf32> to vector<2x8x1xf32>
    %54 = vector.broadcast %53 : vector<2x8x1xf32> to vector<2x8x8xf32>
    %55 = arith.divf %51, %54 : vector<2x8x8xf32>
    %56 = arith.truncf %55 : vector<2x8x8xf32> to vector<2x8x8xbf16>
    %57 = arith.truncf %39 : vector<2x8x16xf32> to vector<2x8x16xbf16>
    "tpu.trace_start"() <{level = 10 : i32, message = "bqk,bkd->bqd"}> : () -> ()
    %cst_26 = arith.constant dense<0.000000e+00> : vector<2x8x16xf32>
    %58 = tpu.matmul %56, %57, %cst_26 {dimension_numbers = #tpu.dot_dimension_numbers<[2], [1], [1], [2], [0, 0, 0, 1, 1, 2], [0], [0]>} : vector<2x8x8xbf16>, vector<2x8x16xbf16>, vector<2x8x16xf32> -> vector<2x8x16xf32>
    "tpu.trace_stop"() : () -> ()
    %59 = vector.shape_cast %58 : vector<2x8x16xf32> to vector<16x16xf32>
    %60 = vector.extract_strided_slice %27 {offsets = [0, 0], sizes = [16, 32], strides = [1, 1]} : vector<32x32xbf16> to vector<16x32xbf16>
    %61 = arith.truncf %59 : vector<16x16xf32> to vector<16x16xbf16>
    %cst_27 = arith.constant dense<0.000000e+00> : vector<16x32xf32>
    %62 = tpu.matmul %61, %60, %cst_27 {dimension_numbers = #tpu.dot_dimension_numbers<[1], [0], [0], [1], [0, 0, 1, 1], [], []>} : vector<16x16xbf16>, vector<16x32xbf16>, vector<16x32xf32> -> vector<16x32xf32>
    %63 = vector.extract_strided_slice %36 {offsets = [0, 0, 16], sizes = [2, 8, 16], strides = [1, 1, 1]} : vector<2x8x96xf32> to vector<2x8x16xf32>
    %64 = vector.extract_strided_slice %36 {offsets = [0, 0, 48], sizes = [2, 8, 16], strides = [1, 1, 1]} : vector<2x8x96xf32> to vector<2x8x16xf32>
    %65 = vector.extract_strided_slice %36 {offsets = [0, 0, 80], sizes = [2, 8, 16], strides = [1, 1, 1]} : vector<2x8x96xf32> to vector<2x8x16xf32>
    %66 = arith.truncf %63 : vector<2x8x16xf32> to vector<2x8x16xbf16>
    %67 = arith.truncf %64 : vector<2x8x16xf32> to vector<2x8x16xbf16>
    "tpu.trace_start"() <{level = 10 : i32, message = "bqd,bkd->bqk"}> : () -> ()
    %cst_28 = arith.constant dense<0.000000e+00> : vector<2x8x8xf32>
    %68 = tpu.matmul %66, %67, %cst_28 {dimension_numbers = #tpu.dot_dimension_numbers<[2], [2], [1], [1], [0, 0, 0, 1, 1, 1], [0], [0]>} : vector<2x8x16xbf16>, vector<2x8x16xbf16>, vector<2x8x8xf32> -> vector<2x8x8xf32>
    "tpu.trace_stop"() : () -> ()
    %cst_29 = arith.constant 2.500000e-01 : f32
    %69 = vector.broadcast %cst_29 : f32 to vector<2x8x8xf32>
    %70 = arith.mulf %68, %69 : vector<2x8x8xf32>
    %71 = vector.broadcast %25 : vector<2x1x8xf32> to vector<2x8x8xf32>
    %72 = arith.addf %70, %71 : vector<2x8x8xf32>
    %cst_30 = arith.constant dense<0xFF800000> : vector<2x8xf32>
    %73 = vector.multi_reduction <maximumf>, %72, %cst_30 [2] : vector<2x8x8xf32> to vector<2x8xf32>
    %74 = vector.shape_cast %73 : vector<2x8xf32> to vector<2x8x1xf32>
    %75 = vector.broadcast %74 : vector<2x8x1xf32> to vector<2x8x8xf32>
    %76 = arith.subf %72, %75 : vector<2x8x8xf32>
    %77 = math.exp %76 : vector<2x8x8xf32>
    %cst_31 = arith.constant dense<0.000000e+00> : vector<2x8xf32>
    %78 = vector.multi_reduction <add>, %77, %cst_31 [2] : vector<2x8x8xf32> to vector<2x8xf32>
    %79 = vector.shape_cast %78 : vector<2x8xf32> to vector<2x8x1xf32>
    %80 = vector.broadcast %79 : vector<2x8x1xf32> to vector<2x8x8xf32>
    %81 = arith.divf %77, %80 : vector<2x8x8xf32>
    %82 = arith.truncf %81 : vector<2x8x8xf32> to vector<2x8x8xbf16>
    %83 = arith.truncf %65 : vector<2x8x16xf32> to vector<2x8x16xbf16>
    "tpu.trace_start"() <{level = 10 : i32, message = "bqk,bkd->bqd"}> : () -> ()
    %cst_32 = arith.constant dense<0.000000e+00> : vector<2x8x16xf32>
    %84 = tpu.matmul %82, %83, %cst_32 {dimension_numbers = #tpu.dot_dimension_numbers<[2], [1], [1], [2], [0, 0, 0, 1, 1, 2], [0], [0]>} : vector<2x8x8xbf16>, vector<2x8x16xbf16>, vector<2x8x16xf32> -> vector<2x8x16xf32>
    "tpu.trace_stop"() : () -> ()
    %85 = vector.shape_cast %84 : vector<2x8x16xf32> to vector<16x16xf32>
    %86 = vector.extract_strided_slice %27 {offsets = [16, 0], sizes = [16, 32], strides = [1, 1]} : vector<32x32xbf16> to vector<16x32xbf16>
    %87 = arith.truncf %85 : vector<16x16xf32> to vector<16x16xbf16>
    %cst_33 = arith.constant dense<0.000000e+00> : vector<16x32xf32>
    %88 = tpu.matmul %87, %86, %cst_33 {dimension_numbers = #tpu.dot_dimension_numbers<[1], [0], [0], [1], [0, 0, 1, 1], [], []>} : vector<16x16xbf16>, vector<16x32xbf16>, vector<16x32xf32> -> vector<16x32xf32>
    %89 = arith.addf %62, %88 : vector<16x32xf32>
    %c0_34 = arith.constant 0 : index
    %c0_35 = arith.constant 0 : index
    %c0_36 = arith.constant 0 : index
    %90 = vector.load %arg7[%c0_34, %c0_35, %c0_36] : memref<2x1x32xf32, #tpu.memory_space<vmem>>, vector<1x1x32xf32>
    %91 = vector.shape_cast %90 : vector<1x1x32xf32> to vector<1x32xf32>
    %92 = vector.broadcast %91 : vector<1x32xf32> to vector<16x32xf32>
    %93 = arith.addf %89, %92 : vector<16x32xf32>
    %94 = arith.addf %24, %93 : vector<16x32xf32>
    %c0_37 = arith.constant 0 : index
    %c0_38 = arith.constant 0 : index
    %c0_39 = arith.constant 0 : index
    %95 = vector.load %arg8[%c0_37, %c0_38, %c0_39] : memref<2x1x32xf32, #tpu.memory_space<vmem>>, vector<1x1x32xf32>
    %96 = vector.shape_cast %95 : vector<1x1x32xf32> to vector<1x32xf32>
    %c0_40 = arith.constant 0 : index
    %c0_41 = arith.constant 0 : index
    %c0_42 = arith.constant 0 : index
    %97 = vector.load %arg9[%c0_40, %c0_41, %c0_42] : memref<2x1x32xf32, #tpu.memory_space<vmem>>, vector<1x1x32xf32>
    %98 = vector.shape_cast %97 : vector<1x1x32xf32> to vector<1x32xf32>
    %cst_43 = arith.constant dense<0.000000e+00> : vector<16xf32>
    %99 = vector.multi_reduction <add>, %94, %cst_43 [1] : vector<16x32xf32> to vector<16xf32>
    %100 = vector.shape_cast %99 : vector<16xf32> to vector<16x1xf32>
    %cst_44 = arith.constant 3.200000e+01 : f32
    %101 = vector.broadcast %cst_44 : f32 to vector<16x1xf32>
    %102 = arith.divf %100, %101 : vector<16x1xf32>
    %103 = vector.broadcast %102 : vector<16x1xf32> to vector<16x32xf32>
    %104 = arith.subf %94, %103 : vector<16x32xf32>
    %105 = arith.mulf %104, %104 : vector<16x32xf32>
    %cst_45 = arith.constant dense<0.000000e+00> : vector<16xf32>
    %106 = vector.multi_reduction <add>, %105, %cst_45 [1] : vector<16x32xf32> to vector<16xf32>
    %107 = vector.shape_cast %106 : vector<16xf32> to vector<16x1xf32>
    %cst_46 = arith.constant 3.200000e+01 : f32
    %108 = vector.broadcast %cst_46 : f32 to vector<16x1xf32>
    %109 = arith.divf %107, %108 : vector<16x1xf32>
    %110 = vector.broadcast %102 : vector<16x1xf32> to vector<16x32xf32>
    %111 = arith.subf %94, %110 : vector<16x32xf32>
    %cst_47 = arith.constant 9.99999996E-13 : f32
    %112 = vector.broadcast %cst_47 : f32 to vector<16x1xf32>
    %113 = arith.addf %109, %112 : vector<16x1xf32>
    %114 = math.rsqrt %113 : vector<16x1xf32>
    %115 = vector.broadcast %114 : vector<16x1xf32> to vector<16x32xf32>
    %116 = arith.mulf %111, %115 : vector<16x32xf32>
    %117 = vector.broadcast %96 : vector<1x32xf32> to vector<16x32xf32>
    %118 = arith.mulf %116, %117 : vector<16x32xf32>
    %119 = vector.broadcast %98 : vector<1x32xf32> to vector<16x32xf32>
    %120 = arith.addf %118, %119 : vector<16x32xf32>
    %c0_48 = arith.constant 0 : index
    %c0_49 = arith.constant 0 : index
    %c0_50 = arith.constant 0 : index
    %121 = vector.load %arg10[%c0_48, %c0_49, %c0_50] : memref<2x32x64xbf16, #tpu.memory_space<vmem>>, vector<1x32x64xbf16>
    %122 = vector.shape_cast %121 : vector<1x32x64xbf16> to vector<32x64xbf16>
    %123 = arith.truncf %120 : vector<16x32xf32> to vector<16x32xbf16>
    %cst_51 = arith.constant dense<0.000000e+00> : vector<16x64xf32>
    %124 = tpu.matmul %123, %122, %cst_51 {dimension_numbers = #tpu.dot_dimension_numbers<[1], [0], [0], [1], [0, 0, 1, 1], [], []>} : vector<16x32xbf16>, vector<32x64xbf16>, vector<16x64xf32> -> vector<16x64xf32>
    %c0_52 = arith.constant 0 : index
    %c0_53 = arith.constant 0 : index
    %c0_54 = arith.constant 0 : index
    %125 = vector.load %arg11[%c0_52, %c0_53, %c0_54] : memref<2x1x64xf32, #tpu.memory_space<vmem>>, vector<1x1x64xf32>
    %126 = vector.shape_cast %125 : vector<1x1x64xf32> to vector<1x64xf32>
    %127 = vector.broadcast %126 : vector<1x64xf32> to vector<16x64xf32>
    %128 = arith.addf %124, %127 : vector<16x64xf32>
    %129 = arith.mulf %128, %128 : vector<16x64xf32>
    %130 = arith.mulf %128, %129 : vector<16x64xf32>
    %cst_55 = arith.constant 4.471500e-02 : f32
    %131 = vector.broadcast %cst_55 : f32 to vector<16x64xf32>
    %132 = arith.mulf %131, %130 : vector<16x64xf32>
    %133 = arith.addf %128, %132 : vector<16x64xf32>
    %cst_56 = arith.constant 0.797884583 : f32
    %134 = vector.broadcast %cst_56 : f32 to vector<16x64xf32>
    %135 = arith.mulf %134, %133 : vector<16x64xf32>
    %136 = math.tanh %135 : vector<16x64xf32>
    %cst_57 = arith.constant 1.000000e+00 : f32
    %137 = vector.broadcast %cst_57 : f32 to vector<16x64xf32>
    %138 = arith.addf %137, %136 : vector<16x64xf32>
    %cst_58 = arith.constant 5.000000e-01 : f32
    %139 = vector.broadcast %cst_58 : f32 to vector<16x64xf32>
    %140 = arith.mulf %139, %138 : vector<16x64xf32>
    %141 = arith.mulf %128, %140 : vector<16x64xf32>
    %c0_59 = arith.constant 0 : index
    %c0_60 = arith.constant 0 : index
    %c0_61 = arith.constant 0 : index
    %142 = vector.load %arg12[%c0_59, %c0_60, %c0_61] : memref<2x64x32xbf16, #tpu.memory_space<vmem>>, vector<1x64x32xbf16>
    %143 = vector.shape_cast %142 : vector<1x64x32xbf16> to vector<64x32xbf16>
    %144 = arith.truncf %141 : vector<16x64xf32> to vector<16x64xbf16>
    %cst_62 = arith.constant dense<0.000000e+00> : vector<16x32xf32>
    %145 = tpu.matmul %144, %143, %cst_62 {dimension_numbers = #tpu.dot_dimension_numbers<[1], [0], [0], [1], [0, 0, 1, 1], [], []>} : vector<16x64xbf16>, vector<64x32xbf16>, vector<16x32xf32> -> vector<16x32xf32>
    %c0_63 = arith.constant 0 : index
    %c0_64 = arith.constant 0 : index
    %c0_65 = arith.constant 0 : index
    %146 = vector.load %arg13[%c0_63, %c0_64, %c0_65] : memref<2x1x32xf32, #tpu.memory_space<vmem>>, vector<1x1x32xf32>
    %147 = vector.shape_cast %146 : vector<1x1x32xf32> to vector<1x32xf32>
    %148 = vector.broadcast %147 : vector<1x32xf32> to vector<16x32xf32>
    %149 = arith.addf %145, %148 : vector<16x32xf32>
    %150 = arith.addf %120, %149 : vector<16x32xf32>
    %c0_66 = arith.constant 0 : index
    %c0_67 = arith.constant 0 : index
    %c0_68 = arith.constant 0 : index
    %151 = vector.load %arg14[%c0_66, %c0_67, %c0_68] : memref<2x1x32xf32, #tpu.memory_space<vmem>>, vector<1x1x32xf32>
    %152 = vector.shape_cast %151 : vector<1x1x32xf32> to vector<1x32xf32>
    %c0_69 = arith.constant 0 : index
    %c0_70 = arith.constant 0 : index
    %c0_71 = arith.constant 0 : index
    %153 = vector.load %arg15[%c0_69, %c0_70, %c0_71] : memref<2x1x32xf32, #tpu.memory_space<vmem>>, vector<1x1x32xf32>
    %154 = vector.shape_cast %153 : vector<1x1x32xf32> to vector<1x32xf32>
    %cst_72 = arith.constant dense<0.000000e+00> : vector<16xf32>
    %155 = vector.multi_reduction <add>, %150, %cst_72 [1] : vector<16x32xf32> to vector<16xf32>
    %156 = vector.shape_cast %155 : vector<16xf32> to vector<16x1xf32>
    %cst_73 = arith.constant 3.200000e+01 : f32
    %157 = vector.broadcast %cst_73 : f32 to vector<16x1xf32>
    %158 = arith.divf %156, %157 : vector<16x1xf32>
    %159 = vector.broadcast %158 : vector<16x1xf32> to vector<16x32xf32>
    %160 = arith.subf %150, %159 : vector<16x32xf32>
    %161 = arith.mulf %160, %160 : vector<16x32xf32>
    %cst_74 = arith.constant dense<0.000000e+00> : vector<16xf32>
    %162 = vector.multi_reduction <add>, %161, %cst_74 [1] : vector<16x32xf32> to vector<16xf32>
    %163 = vector.shape_cast %162 : vector<16xf32> to vector<16x1xf32>
    %cst_75 = arith.constant 3.200000e+01 : f32
    %164 = vector.broadcast %cst_75 : f32 to vector<16x1xf32>
    %165 = arith.divf %163, %164 : vector<16x1xf32>
    %166 = vector.broadcast %158 : vector<16x1xf32> to vector<16x32xf32>
    %167 = arith.subf %150, %166 : vector<16x32xf32>
    %cst_76 = arith.constant 9.99999996E-13 : f32
    %168 = vector.broadcast %cst_76 : f32 to vector<16x1xf32>
    %169 = arith.addf %165, %168 : vector<16x1xf32>
    %170 = math.rsqrt %169 : vector<16x1xf32>
    %171 = vector.broadcast %170 : vector<16x1xf32> to vector<16x32xf32>
    %172 = arith.mulf %167, %171 : vector<16x32xf32>
    %173 = vector.broadcast %152 : vector<1x32xf32> to vector<16x32xf32>
    %174 = arith.mulf %172, %173 : vector<16x32xf32>
    %175 = vector.broadcast %154 : vector<1x32xf32> to vector<16x32xf32>
    %176 = arith.addf %174, %175 : vector<16x32xf32>
    %c1 = arith.constant 1 : index
    %c0_77 = arith.constant 0 : index
    %c0_78 = arith.constant 0 : index
    %177 = vector.load %arg6[%c1, %c0_77, %c0_78] : memref<2x32x32xbf16, #tpu.memory_space<vmem>>, vector<1x32x32xbf16>
    %178 = vector.shape_cast %177 : vector<1x32x32xbf16> to vector<32x32xbf16>
    %c1_79 = arith.constant 1 : index
    %c0_80 = arith.constant 0 : index
    %c0_81 = arith.constant 0 : index
    %179 = vector.load %arg4[%c1_79, %c0_80, %c0_81] : memref<2x32x96xbf16, #tpu.memory_space<vmem>>, vector<1x32x96xbf16>
    %180 = vector.shape_cast %179 : vector<1x32x96xbf16> to vector<32x96xbf16>
    %181 = arith.truncf %176 : vector<16x32xf32> to vector<16x32xbf16>
    %cst_82 = arith.constant dense<0.000000e+00> : vector<16x96xf32>
    %182 = tpu.matmul %181, %180, %cst_82 {dimension_numbers = #tpu.dot_dimension_numbers<[1], [0], [0], [1], [0, 0, 1, 1], [], []>} : vector<16x32xbf16>, vector<32x96xbf16>, vector<16x96xf32> -> vector<16x96xf32>
    %c1_83 = arith.constant 1 : index
    %c0_84 = arith.constant 0 : index
    %c0_85 = arith.constant 0 : index
    %183 = vector.load %arg5[%c1_83, %c0_84, %c0_85] : memref<2x1x96xf32, #tpu.memory_space<vmem>>, vector<1x1x96xf32>
    %184 = vector.shape_cast %183 : vector<1x1x96xf32> to vector<1x96xf32>
    %185 = vector.broadcast %184 : vector<1x96xf32> to vector<16x96xf32>
    %186 = arith.addf %182, %185 : vector<16x96xf32>
    %187 = vector.shape_cast %186 : vector<16x96xf32> to vector<2x8x96xf32>
    %188 = vector.extract_strided_slice %187 {offsets = [0, 0, 0], sizes = [2, 8, 16], strides = [1, 1, 1]} : vector<2x8x96xf32> to vector<2x8x16xf32>
    %189 = vector.extract_strided_slice %187 {offsets = [0, 0, 32], sizes = [2, 8, 16], strides = [1, 1, 1]} : vector<2x8x96xf32> to vector<2x8x16xf32>
    %190 = vector.extract_strided_slice %187 {offsets = [0, 0, 64], sizes = [2, 8, 16], strides = [1, 1, 1]} : vector<2x8x96xf32> to vector<2x8x16xf32>
    %191 = arith.truncf %188 : vector<2x8x16xf32> to vector<2x8x16xbf16>
    %192 = arith.truncf %189 : vector<2x8x16xf32> to vector<2x8x16xbf16>
    "tpu.trace_start"() <{level = 10 : i32, message = "bqd,bkd->bqk"}> : () -> ()
    %cst_86 = arith.constant dense<0.000000e+00> : vector<2x8x8xf32>
    %193 = tpu.matmul %191, %192, %cst_86 {dimension_numbers = #tpu.dot_dimension_numbers<[2], [2], [1], [1], [0, 0, 0, 1, 1, 1], [0], [0]>} : vector<2x8x16xbf16>, vector<2x8x16xbf16>, vector<2x8x8xf32> -> vector<2x8x8xf32>
    "tpu.trace_stop"() : () -> ()
    %cst_87 = arith.constant 2.500000e-01 : f32
    %194 = vector.broadcast %cst_87 : f32 to vector<2x8x8xf32>
    %195 = arith.mulf %193, %194 : vector<2x8x8xf32>
    %196 = vector.broadcast %25 : vector<2x1x8xf32> to vector<2x8x8xf32>
    %197 = arith.addf %195, %196 : vector<2x8x8xf32>
    %cst_88 = arith.constant dense<0xFF800000> : vector<2x8xf32>
    %198 = vector.multi_reduction <maximumf>, %197, %cst_88 [2] : vector<2x8x8xf32> to vector<2x8xf32>
    %199 = vector.shape_cast %198 : vector<2x8xf32> to vector<2x8x1xf32>
    %200 = vector.broadcast %199 : vector<2x8x1xf32> to vector<2x8x8xf32>
    %201 = arith.subf %197, %200 : vector<2x8x8xf32>
    %202 = math.exp %201 : vector<2x8x8xf32>
    %cst_89 = arith.constant dense<0.000000e+00> : vector<2x8xf32>
    %203 = vector.multi_reduction <add>, %202, %cst_89 [2] : vector<2x8x8xf32> to vector<2x8xf32>
    %204 = vector.shape_cast %203 : vector<2x8xf32> to vector<2x8x1xf32>
    %205 = vector.broadcast %204 : vector<2x8x1xf32> to vector<2x8x8xf32>
    %206 = arith.divf %202, %205 : vector<2x8x8xf32>
    %207 = arith.truncf %206 : vector<2x8x8xf32> to vector<2x8x8xbf16>
    %208 = arith.truncf %190 : vector<2x8x16xf32> to vector<2x8x16xbf16>
    "tpu.trace_start"() <{level = 10 : i32, message = "bqk,bkd->bqd"}> : () -> ()
    %cst_90 = arith.constant dense<0.000000e+00> : vector<2x8x16xf32>
    %209 = tpu.matmul %207, %208, %cst_90 {dimension_numbers = #tpu.dot_dimension_numbers<[2], [1], [1], [2], [0, 0, 0, 1, 1, 2], [0], [0]>} : vector<2x8x8xbf16>, vector<2x8x16xbf16>, vector<2x8x16xf32> -> vector<2x8x16xf32>
    "tpu.trace_stop"() : () -> ()
    %210 = vector.shape_cast %209 : vector<2x8x16xf32> to vector<16x16xf32>
    %211 = vector.extract_strided_slice %178 {offsets = [0, 0], sizes = [16, 32], strides = [1, 1]} : vector<32x32xbf16> to vector<16x32xbf16>
    %212 = arith.truncf %210 : vector<16x16xf32> to vector<16x16xbf16>
    %cst_91 = arith.constant dense<0.000000e+00> : vector<16x32xf32>
    %213 = tpu.matmul %212, %211, %cst_91 {dimension_numbers = #tpu.dot_dimension_numbers<[1], [0], [0], [1], [0, 0, 1, 1], [], []>} : vector<16x16xbf16>, vector<16x32xbf16>, vector<16x32xf32> -> vector<16x32xf32>
    %214 = vector.extract_strided_slice %187 {offsets = [0, 0, 16], sizes = [2, 8, 16], strides = [1, 1, 1]} : vector<2x8x96xf32> to vector<2x8x16xf32>
    %215 = vector.extract_strided_slice %187 {offsets = [0, 0, 48], sizes = [2, 8, 16], strides = [1, 1, 1]} : vector<2x8x96xf32> to vector<2x8x16xf32>
    %216 = vector.extract_strided_slice %187 {offsets = [0, 0, 80], sizes = [2, 8, 16], strides = [1, 1, 1]} : vector<2x8x96xf32> to vector<2x8x16xf32>
    %217 = arith.truncf %214 : vector<2x8x16xf32> to vector<2x8x16xbf16>
    %218 = arith.truncf %215 : vector<2x8x16xf32> to vector<2x8x16xbf16>
    "tpu.trace_start"() <{level = 10 : i32, message = "bqd,bkd->bqk"}> : () -> ()
    %cst_92 = arith.constant dense<0.000000e+00> : vector<2x8x8xf32>
    %219 = tpu.matmul %217, %218, %cst_92 {dimension_numbers = #tpu.dot_dimension_numbers<[2], [2], [1], [1], [0, 0, 0, 1, 1, 1], [0], [0]>} : vector<2x8x16xbf16>, vector<2x8x16xbf16>, vector<2x8x8xf32> -> vector<2x8x8xf32>
    "tpu.trace_stop"() : () -> ()
    %cst_93 = arith.constant 2.500000e-01 : f32
    %220 = vector.broadcast %cst_93 : f32 to vector<2x8x8xf32>
    %221 = arith.mulf %219, %220 : vector<2x8x8xf32>
    %222 = vector.broadcast %25 : vector<2x1x8xf32> to vector<2x8x8xf32>
    %223 = arith.addf %221, %222 : vector<2x8x8xf32>
    %cst_94 = arith.constant dense<0xFF800000> : vector<2x8xf32>
    %224 = vector.multi_reduction <maximumf>, %223, %cst_94 [2] : vector<2x8x8xf32> to vector<2x8xf32>
    %225 = vector.shape_cast %224 : vector<2x8xf32> to vector<2x8x1xf32>
    %226 = vector.broadcast %225 : vector<2x8x1xf32> to vector<2x8x8xf32>
    %227 = arith.subf %223, %226 : vector<2x8x8xf32>
    %228 = math.exp %227 : vector<2x8x8xf32>
    %cst_95 = arith.constant dense<0.000000e+00> : vector<2x8xf32>
    %229 = vector.multi_reduction <add>, %228, %cst_95 [2] : vector<2x8x8xf32> to vector<2x8xf32>
    %230 = vector.shape_cast %229 : vector<2x8xf32> to vector<2x8x1xf32>
    %231 = vector.broadcast %230 : vector<2x8x1xf32> to vector<2x8x8xf32>
    %232 = arith.divf %228, %231 : vector<2x8x8xf32>
    %233 = arith.truncf %232 : vector<2x8x8xf32> to vector<2x8x8xbf16>
    %234 = arith.truncf %216 : vector<2x8x16xf32> to vector<2x8x16xbf16>
    "tpu.trace_start"() <{level = 10 : i32, message = "bqk,bkd->bqd"}> : () -> ()
    %cst_96 = arith.constant dense<0.000000e+00> : vector<2x8x16xf32>
    %235 = tpu.matmul %233, %234, %cst_96 {dimension_numbers = #tpu.dot_dimension_numbers<[2], [1], [1], [2], [0, 0, 0, 1, 1, 2], [0], [0]>} : vector<2x8x8xbf16>, vector<2x8x16xbf16>, vector<2x8x16xf32> -> vector<2x8x16xf32>
    "tpu.trace_stop"() : () -> ()
    %236 = vector.shape_cast %235 : vector<2x8x16xf32> to vector<16x16xf32>
    %237 = vector.extract_strided_slice %178 {offsets = [16, 0], sizes = [16, 32], strides = [1, 1]} : vector<32x32xbf16> to vector<16x32xbf16>
    %238 = arith.truncf %236 : vector<16x16xf32> to vector<16x16xbf16>
    %cst_97 = arith.constant dense<0.000000e+00> : vector<16x32xf32>
    %239 = tpu.matmul %238, %237, %cst_97 {dimension_numbers = #tpu.dot_dimension_numbers<[1], [0], [0], [1], [0, 0, 1, 1], [], []>} : vector<16x16xbf16>, vector<16x32xbf16>, vector<16x32xf32> -> vector<16x32xf32>
    %240 = arith.addf %213, %239 : vector<16x32xf32>
    %c1_98 = arith.constant 1 : index
    %c0_99 = arith.constant 0 : index
    %c0_100 = arith.constant 0 : index
    %241 = vector.load %arg7[%c1_98, %c0_99, %c0_100] : memref<2x1x32xf32, #tpu.memory_space<vmem>>, vector<1x1x32xf32>
    %242 = vector.shape_cast %241 : vector<1x1x32xf32> to vector<1x32xf32>
    %243 = vector.broadcast %242 : vector<1x32xf32> to vector<16x32xf32>
    %244 = arith.addf %240, %243 : vector<16x32xf32>
    %245 = arith.addf %176, %244 : vector<16x32xf32>
    %c1_101 = arith.constant 1 : index
    %c0_102 = arith.constant 0 : index
    %c0_103 = arith.constant 0 : index
    %246 = vector.load %arg8[%c1_101, %c0_102, %c0_103] : memref<2x1x32xf32, #tpu.memory_space<vmem>>, vector<1x1x32xf32>
    %247 = vector.shape_cast %246 : vector<1x1x32xf32> to vector<1x32xf32>
    %c1_104 = arith.constant 1 : index
    %c0_105 = arith.constant 0 : index
    %c0_106 = arith.constant 0 : index
    %248 = vector.load %arg9[%c1_104, %c0_105, %c0_106] : memref<2x1x32xf32, #tpu.memory_space<vmem>>, vector<1x1x32xf32>
    %249 = vector.shape_cast %248 : vector<1x1x32xf32> to vector<1x32xf32>
    %cst_107 = arith.constant dense<0.000000e+00> : vector<16xf32>
    %250 = vector.multi_reduction <add>, %245, %cst_107 [1] : vector<16x32xf32> to vector<16xf32>
    %251 = vector.shape_cast %250 : vector<16xf32> to vector<16x1xf32>
    %cst_108 = arith.constant 3.200000e+01 : f32
    %252 = vector.broadcast %cst_108 : f32 to vector<16x1xf32>
    %253 = arith.divf %251, %252 : vector<16x1xf32>
    %254 = vector.broadcast %253 : vector<16x1xf32> to vector<16x32xf32>
    %255 = arith.subf %245, %254 : vector<16x32xf32>
    %256 = arith.mulf %255, %255 : vector<16x32xf32>
    %cst_109 = arith.constant dense<0.000000e+00> : vector<16xf32>
    %257 = vector.multi_reduction <add>, %256, %cst_109 [1] : vector<16x32xf32> to vector<16xf32>
    %258 = vector.shape_cast %257 : vector<16xf32> to vector<16x1xf32>
    %cst_110 = arith.constant 3.200000e+01 : f32
    %259 = vector.broadcast %cst_110 : f32 to vector<16x1xf32>
    %260 = arith.divf %258, %259 : vector<16x1xf32>
    %261 = vector.broadcast %253 : vector<16x1xf32> to vector<16x32xf32>
    %262 = arith.subf %245, %261 : vector<16x32xf32>
    %cst_111 = arith.constant 9.99999996E-13 : f32
    %263 = vector.broadcast %cst_111 : f32 to vector<16x1xf32>
    %264 = arith.addf %260, %263 : vector<16x1xf32>
    %265 = math.rsqrt %264 : vector<16x1xf32>
    %266 = vector.broadcast %265 : vector<16x1xf32> to vector<16x32xf32>
    %267 = arith.mulf %262, %266 : vector<16x32xf32>
    %268 = vector.broadcast %247 : vector<1x32xf32> to vector<16x32xf32>
    %269 = arith.mulf %267, %268 : vector<16x32xf32>
    %270 = vector.broadcast %249 : vector<1x32xf32> to vector<16x32xf32>
    %271 = arith.addf %269, %270 : vector<16x32xf32>
    %c1_112 = arith.constant 1 : index
    %c0_113 = arith.constant 0 : index
    %c0_114 = arith.constant 0 : index
    %272 = vector.load %arg10[%c1_112, %c0_113, %c0_114] : memref<2x32x64xbf16, #tpu.memory_space<vmem>>, vector<1x32x64xbf16>
    %273 = vector.shape_cast %272 : vector<1x32x64xbf16> to vector<32x64xbf16>
    %274 = arith.truncf %271 : vector<16x32xf32> to vector<16x32xbf16>
    %cst_115 = arith.constant dense<0.000000e+00> : vector<16x64xf32>
    %275 = tpu.matmul %274, %273, %cst_115 {dimension_numbers = #tpu.dot_dimension_numbers<[1], [0], [0], [1], [0, 0, 1, 1], [], []>} : vector<16x32xbf16>, vector<32x64xbf16>, vector<16x64xf32> -> vector<16x64xf32>
    %c1_116 = arith.constant 1 : index
    %c0_117 = arith.constant 0 : index
    %c0_118 = arith.constant 0 : index
    %276 = vector.load %arg11[%c1_116, %c0_117, %c0_118] : memref<2x1x64xf32, #tpu.memory_space<vmem>>, vector<1x1x64xf32>
    %277 = vector.shape_cast %276 : vector<1x1x64xf32> to vector<1x64xf32>
    %278 = vector.broadcast %277 : vector<1x64xf32> to vector<16x64xf32>
    %279 = arith.addf %275, %278 : vector<16x64xf32>
    %280 = arith.mulf %279, %279 : vector<16x64xf32>
    %281 = arith.mulf %279, %280 : vector<16x64xf32>
    %cst_119 = arith.constant 4.471500e-02 : f32
    %282 = vector.broadcast %cst_119 : f32 to vector<16x64xf32>
    %283 = arith.mulf %282, %281 : vector<16x64xf32>
    %284 = arith.addf %279, %283 : vector<16x64xf32>
    %cst_120 = arith.constant 0.797884583 : f32
    %285 = vector.broadcast %cst_120 : f32 to vector<16x64xf32>
    %286 = arith.mulf %285, %284 : vector<16x64xf32>
    %287 = math.tanh %286 : vector<16x64xf32>
    %cst_121 = arith.constant 1.000000e+00 : f32
    %288 = vector.broadcast %cst_121 : f32 to vector<16x64xf32>
    %289 = arith.addf %288, %287 : vector<16x64xf32>
    %cst_122 = arith.constant 5.000000e-01 : f32
    %290 = vector.broadcast %cst_122 : f32 to vector<16x64xf32>
    %291 = arith.mulf %290, %289 : vector<16x64xf32>
    %292 = arith.mulf %279, %291 : vector<16x64xf32>
    %c1_123 = arith.constant 1 : index
    %c0_124 = arith.constant 0 : index
    %c0_125 = arith.constant 0 : index
    %293 = vector.load %arg12[%c1_123, %c0_124, %c0_125] : memref<2x64x32xbf16, #tpu.memory_space<vmem>>, vector<1x64x32xbf16>
    %294 = vector.shape_cast %293 : vector<1x64x32xbf16> to vector<64x32xbf16>
    %295 = arith.truncf %292 : vector<16x64xf32> to vector<16x64xbf16>
    %cst_126 = arith.constant dense<0.000000e+00> : vector<16x32xf32>
    %296 = tpu.matmul %295, %294, %cst_126 {dimension_numbers = #tpu.dot_dimension_numbers<[1], [0], [0], [1], [0, 0, 1, 1], [], []>} : vector<16x64xbf16>, vector<64x32xbf16>, vector<16x32xf32> -> vector<16x32xf32>
    %c1_127 = arith.constant 1 : index
    %c0_128 = arith.constant 0 : index
    %c0_129 = arith.constant 0 : index
    %297 = vector.load %arg13[%c1_127, %c0_128, %c0_129] : memref<2x1x32xf32, #tpu.memory_space<vmem>>, vector<1x1x32xf32>
    %298 = vector.shape_cast %297 : vector<1x1x32xf32> to vector<1x32xf32>
    %299 = vector.broadcast %298 : vector<1x32xf32> to vector<16x32xf32>
    %300 = arith.addf %296, %299 : vector<16x32xf32>
    %301 = arith.addf %271, %300 : vector<16x32xf32>
    %c1_130 = arith.constant 1 : index
    %c0_131 = arith.constant 0 : index
    %c0_132 = arith.constant 0 : index
    %302 = vector.load %arg14[%c1_130, %c0_131, %c0_132] : memref<2x1x32xf32, #tpu.memory_space<vmem>>, vector<1x1x32xf32>
    %303 = vector.shape_cast %302 : vector<1x1x32xf32> to vector<1x32xf32>
    %c1_133 = arith.constant 1 : index
    %c0_134 = arith.constant 0 : index
    %c0_135 = arith.constant 0 : index
    %304 = vector.load %arg15[%c1_133, %c0_134, %c0_135] : memref<2x1x32xf32, #tpu.memory_space<vmem>>, vector<1x1x32xf32>
    %305 = vector.shape_cast %304 : vector<1x1x32xf32> to vector<1x32xf32>
    %cst_136 = arith.constant dense<0.000000e+00> : vector<16xf32>
    %306 = vector.multi_reduction <add>, %301, %cst_136 [1] : vector<16x32xf32> to vector<16xf32>
    %307 = vector.shape_cast %306 : vector<16xf32> to vector<16x1xf32>
    %cst_137 = arith.constant 3.200000e+01 : f32
    %308 = vector.broadcast %cst_137 : f32 to vector<16x1xf32>
    %309 = arith.divf %307, %308 : vector<16x1xf32>
    %310 = vector.broadcast %309 : vector<16x1xf32> to vector<16x32xf32>
    %311 = arith.subf %301, %310 : vector<16x32xf32>
    %312 = arith.mulf %311, %311 : vector<16x32xf32>
    %cst_138 = arith.constant dense<0.000000e+00> : vector<16xf32>
    %313 = vector.multi_reduction <add>, %312, %cst_138 [1] : vector<16x32xf32> to vector<16xf32>
    %314 = vector.shape_cast %313 : vector<16xf32> to vector<16x1xf32>
    %cst_139 = arith.constant 3.200000e+01 : f32
    %315 = vector.broadcast %cst_139 : f32 to vector<16x1xf32>
    %316 = arith.divf %314, %315 : vector<16x1xf32>
    %317 = vector.broadcast %309 : vector<16x1xf32> to vector<16x32xf32>
    %318 = arith.subf %301, %317 : vector<16x32xf32>
    %cst_140 = arith.constant 9.99999996E-13 : f32
    %319 = vector.broadcast %cst_140 : f32 to vector<16x1xf32>
    %320 = arith.addf %316, %319 : vector<16x1xf32>
    %321 = math.rsqrt %320 : vector<16x1xf32>
    %322 = vector.broadcast %321 : vector<16x1xf32> to vector<16x32xf32>
    %323 = arith.mulf %318, %322 : vector<16x32xf32>
    %324 = vector.broadcast %303 : vector<1x32xf32> to vector<16x32xf32>
    %325 = arith.mulf %323, %324 : vector<16x32xf32>
    %326 = vector.broadcast %305 : vector<1x32xf32> to vector<16x32xf32>
    %327 = arith.addf %325, %326 : vector<16x32xf32>
    %c0_141 = arith.constant 0 : index
    %c0_142 = arith.constant 0 : index
    %328 = vector.load %arg16[%c0_141, %c0_142] : memref<32x32xbf16, #tpu.memory_space<vmem>>, vector<32x32xbf16>
    %329 = arith.truncf %327 : vector<16x32xf32> to vector<16x32xbf16>
    %cst_143 = arith.constant dense<0.000000e+00> : vector<16x32xf32>
    %330 = tpu.matmul %329, %328, %cst_143 {dimension_numbers = #tpu.dot_dimension_numbers<[1], [0], [0], [1], [0, 0, 1, 1], [], []>} : vector<16x32xbf16>, vector<32x32xbf16>, vector<16x32xf32> -> vector<16x32xf32>
    %c0_144 = arith.constant 0 : index
    %c0_145 = arith.constant 0 : index
    %331 = vector.load %arg17[%c0_144, %c0_145] : memref<1x32xf32, #tpu.memory_space<vmem>>, vector<1x32xf32>
    %332 = vector.broadcast %331 : vector<1x32xf32> to vector<16x32xf32>
    %333 = arith.addf %330, %332 : vector<16x32xf32>
    %334 = math.tanh %333 : vector<16x32xf32>
    %c0_146 = arith.constant 0 : index
    %c0_147 = arith.constant 0 : index
    %335 = vector.load %arg18[%c0_146, %c0_147] : memref<32x128xbf16, #tpu.memory_space<vmem>>, vector<32x128xbf16>
    %336 = arith.truncf %334 : vector<16x32xf32> to vector<16x32xbf16>
    %cst_148 = arith.constant dense<0.000000e+00> : vector<16x128xf32>
    %337 = tpu.matmul %336, %335, %cst_148 {dimension_numbers = #tpu.dot_dimension_numbers<[1], [0], [0], [1], [0, 0, 1, 1], [], []>} : vector<16x32xbf16>, vector<32x128xbf16>, vector<16x128xf32> -> vector<16x128xf32>
    %c0_149 = arith.constant 0 : index
    %c0_150 = arith.constant 0 : index
    %338 = vector.load %arg19[%c0_149, %c0_150] : memref<1x128xf32, #tpu.memory_space<vmem>>, vector<1x128xf32>
    %339 = vector.broadcast %338 : vector<1x128xf32> to vector<16x128xf32>
    %340 = arith.addf %337, %339 : vector<16x128xf32>
    %c0_151 = arith.constant 0 : index
    %c0_152 = arith.constant 0 : index
    %341 = vector.load %arg20[%c0_151, %c0_152] : memref<16x128xf32, #tpu.memory_space<vmem>>, vector<16x128xf32>
    tpu.vector_store %arg20[%c0_151, %c0_152], %340 {strides = array<i32>} : memref<16x128xf32, #tpu.memory_space<vmem>>, vector<16x128xf32>,
    return
  }
}

</mosaic_0001>

<bundles_post_ra>
// kernel: sentiment_classifier_forward.1
= control target key start
LH: loop header
LB: loop body
LE: loop exit
PB: predicated region body
PF: predicated region fallthrough
CT: control target
= control target key end

     0   :  { %vm70_vm0 = vcmask 261120   ;;  %v2531_v15 = vmov 0.0   ;;  %vm2532_vm1 = vmmov 0   ;;  %vm193_vm2 = vcmask 130048   ;;  %s2536_s29 = smov 112   ;;  %s3064_s0 = inlined_call_operand.vmem [shape: f32[16,32], index: 0, kind: input, shape index: {}]   ;;  %s3065_s4 = inlined_call_operand.vmem [shape: bf16[2,32,96], index: 4, kind: input, shape index: {}]   ;;  %s3066_s2 = inlined_call_operand.vmem [shape: f32[1,32], index: 2, kind: input, shape index: {}]   ;;  %s3067_s3 = inlined_call_operand.vmem [shape: f32[1,32], index: 3, kind: input, shape index: {}]   ;;  %s3068_s5 = inlined_call_operand.vmem [shape: f32[2,1,96], index: 5, kind: input, shape index: {}]   ;;  %s3069_s1 = inlined_call_operand.vmem [shape: f32[2,1,8], index: 1, kind: input, shape index: {}]   ;;  %s3070_s6 = inlined_call_operand.vmem [shape: bf16[2,32,32], index: 6, kind: input, shape index: {}]   ;;  %s3071_s7 = inlined_call_operand.vmem [shape: f32[2,1,32], index: 7, kind: input, shape index: {}]   ;;  %s3072_s10 = inlined_call_operand.vmem [shape: bf16[2,32,64], index: 10, kind: input, shape index: {}]   ;;  %s3073_s8 = inlined_call_operand.vmem [shape: f32[2,1,32], index: 8, kind: input, shape index: {}]   ;;  %s3074_s9 = inlined_call_operand.vmem [shape: f32[2,1,32], index: 9, kind: input, shape index: {}]   ;;  %s3075_s12 = inlined_call_operand.vmem [shape: bf16[2,64,32], index: 12, kind: input, shape index: {}]   ;;  %s3076_s11 = inlined_call_operand.vmem [shape: f32[2,1,64], index: 11, kind: input, shape index: {}]   ;;  %s3077_s13 = inlined_call_operand.vmem [shape: f32[2,1,32], index: 13, kind: input, shape index: {}]   ;;  %s3078_s14 = inlined_call_operand.vmem [shape: f32[2,1,32], index: 14, kind: input, shape index: {}]   ;;  %s3079_s15 = inlined_call_operand.vmem [shape: f32[2,1,32], index: 15, kind: input, shape index: {}]   ;;  %s3080_s16 = inlined_call_operand.vmem [shape: bf16[32,32], index: 16, kind: input, shape index: {}]   ;;  %s3081_s18 = inlined_call_operand.vmem [shape: bf16[32,128], index: 18, kind: input, shape index: {}]   ;;  %s3082_s17 = inlined_call_operand.vmem [shape: f32[1,32], index: 17, kind: input, shape index: {}]   ;;  %s3083_s19 = inlined_call_operand.vmem [shape: f32[1,128], index: 19, kind: input, shape index: {}]   ;;  %s3084_s20 = inlined_call_operand.vmem [shape: f32[16,128], index: 20, kind: output, shape index: {}]  }
   0x1   :  { %3088 = sst [smem:[#allocation2_spill]] %s3064_s0  ;;  %2244 = vmatprep.subr.bf16.mxu0 %v2531_v15  ;;  %2252 = vmatprep.subr.bf16.mxu1 %v2531_v15  ;;  %v2708_v48 = vld [vmem:[%s3069_s1] ss:$0 sm:$0xff]  ;;  %vm305_vm3 = vcmask 64512   ;;  %v2713_v53 = vld [vmem:[%s3069_s1 + $0x1] ss:$0 sm:$0xff] }
   0x2   :  { %3089 = sst [smem:[#allocation3_spill]] %s3065_s4  ;;  %s3093_s23 = sld [smem:[#allocation2_spill]]  ;;  %2248 = vmatprep.mubr.msk.bf16.mxu0 %vm2532_vm1, %v2531_v15  ;;  %2254 = vmatprep.mubr.msk.bf16.mxu1 %vm2532_vm1, %v2531_v15  ;;  %vm335_vm4 = vcmask 1043456   ;;  %vm934_vm5 = vcmask 523264  }
   0x3   :  { %3090 = sst [smem:[#allocation4_spill]] %s3066_s2  ;;  %s3094_s26 = sld [smem:[#allocation3_spill]] }
   0x4   :  { %3091 = sst [smem:[#allocation5_spill]] %s3067_s3  ;;  %s3095_s30 = sld [smem:[#allocation4_spill]] }
   0x5   :  { %3092 = sst [smem:[#allocation6_spill]] %s3068_s5  ;;  %s3096_s4 = sld [smem:[#allocation5_spill]] }
   0x6   :  { %s3097_s24 = sld [smem:[#allocation6_spill]]  ;;  %s2533_s2 = smov 96  }
   0x7   :  { %s2534_s5 = smov 64   ;;  %s2535_s1 = smov 80  }
   0x8   :  { %v66_v0 = vld [vmem:[%s3093_s23] sm:$0xff]  ;;  %v67_v1 = vld [vmem:[%s3093_s23 + $0x8] sm:$0xff] }
   0x9   :  { %v71_v2 = vsel %vm70_vm0, %v66_v0, 0.0  ;;  %v74_v3 = vsel %vm70_vm0, %v67_v1, 0.0  ;;  %v2443_v14 = vld [vmem:[%s3094_s26] sm:$0xff]   ;;  %v2444_v16 = vld [vmem:[%s3094_s26 + $0x8] sm:$0xff]  }
   0xa   :  { %72 = vadd.xlane.f32.xlu0 %v71_v2  ;;  %2245 = vmatpush3.bf16.msra.mxu0 %v2443_v14  ;;  %v2074_v25 = vld [vmem:[%s3095_s30] ss:$0 sm:$0xff]  ;;  %s2537_s30 = smov 48  }
   0xb   :  { %2246 = vmatprep.subr.bf16.mxu0 %v2531_v15  ;;  %v2075_v29 = vld [vmem:[%s3096_s4] ss:$0 sm:$0xff] }
   0xc   :  { %v2076_v34 = vld [vmem:[%s3097_s24] ss:$0 sm:$0xff] }
   0xe   :  { %75 = vadd.xlane.f32.xlu0 %v74_v3  ;;  %2247 = vmatpush3.bf16.msra.mxu0 %v2444_v16 }
   0xf   :  { %2258 = vmatprep.subr.bf16.mxu0 %v2531_v15 }
  0x97   :  { %v73_v4 = vpop.xlane.xlu0 %72 }
  0x98   :  { %v78_v5 = vmul.f32 0.03125, %v73_v4 }
  0x9a   :  { %v80_v6 = vsub.f32 %v66_v0, %v78_v5 }
  0x9b   :  { %v76_v7 = vpop.xlane.xlu0 %75 }
  0x9c   :  { %v79_v8 = vmul.f32 0.03125, %v76_v7  ;;  %v82_v9 = vmul.f32 %v80_v6, %v80_v6 }
  0x9e   :  { %v81_v10 = vsub.f32 %v67_v1, %v79_v8  ;;  %v84_v11 = vsel %vm70_vm0, %v82_v9, 0.0 }
  0x9f   :  { %85 = vadd.xlane.f32.xlu1 %v84_v11 }
  0xa0   :  { %v83_v12 = vmul.f32 %v81_v10, %v81_v10 }
  0xa2   :  { %v87_v13 = vsel %vm70_vm0, %v83_v12, 0.0 }
  0xa3   :  { %88 = vadd.xlane.f32.xlu1 %v87_v13 }
 0x12c   :  { %v86_v17 = vpop.xlane.xlu1 %85 }
 0x12d   :  { %v90_v18 = vmul.f32 0.03125, %v86_v17 }
 0x12f   :  { %v92_v19 = vadd.f32 1e-12, %v90_v18 }
 0x130   :  { %v89_v20 = vpop.xlane.xlu1 %88 }
 0x131   :  { %2467 = vrsqrt.f32 %v92_v19  ;;  %v91_v21 = vmul.f32 0.03125, %v89_v20 }
 0x133   :  { %v93_v22 = vadd.f32 1e-12, %v91_v21 }
 0x135   :  { %2469 = vrsqrt.f32 %v93_v22 }
 0x13b   :  { %v2468_v23 = vpop.eup %2467 }
 0x13c   :  { %v96_v24 = vmul.f32 %v2468_v23, %v80_v6 }
 0x13e   :  { %v104_v28 = vmul.f32 %v2074_v25, %v96_v24 }
 0x13f   :  { %v2470_v26 = vpop.eup %2469 }
 0x140   :  { %v97_v27 = vmul.f32 %v2470_v26, %v81_v10  ;;  %v2673_v31 = vadd.f32 %v2075_v29, %v104_v28 }
 0x142   :  { %v105_v30 = vmul.f32 %v2074_v25, %v97_v27 }
 0x144   :  { %v2675_v32 = vadd.f32 %v2075_v29, %v105_v30 }
 0x146   :  { %v124_v33 = vpack.c.bf16 %v2675_v32, %v2673_v31 }
 0x148   :  { %2249 = vmatmul.mubr.msk.bf16.vlgmr.msra.gmra.mrb[0].mxu0 %vm70_vm0, %v124_v33 }
 0x149   :  { %2260 = vmatprep.mubr.msk.bf16.mxu0 %vm2532_vm1, %v2531_v15 }
 0x21b   :  { %v181_v35 = vpop.f32.mrb[0].mxu0 }
 0x21c   :  { %v182_v36 = vadd.f32 %v2076_v34, %v181_v35  ;;  %v2250_v37 = vpop.f32.mrb[1].mxu0 }
 0x21d   :  { %v184_v38 = vpop.f32.mrb[2].mxu0 }
 0x21e   :  { %v2685_v39 = vpack.c.bf16 %v182_v36, %v182_v36  ;;  %v185_v40 = vadd.f32 %v2076_v34, %v184_v38  ;;  %v2251_v41 = vpop.f32.mrb[3].mxu0 }
 0x220   :  { %v2687_v42 = vpack.c.bf16 %v185_v40, %v185_v40  ;;  %191 = vrot.lane.b32.xlu0 %v2685_v39, %s2533_s2 }
 0x222   :  { %241 = vrot.lane.b32.xlu1 %v2687_v42, %s2533_s2 }
 0x292   :  { %v192_v43 = vpop.permute.xlu0 %191 }
 0x293   :  { %v198_v44 = vsel %vm193_vm2, %v192_v43, 0 }
 0x294   :  { %2253 = vmatpush3.bf16.xpose.msra.mxu1 %v198_v44  ;;  %v242_v45 = vpop.permute.xlu1 %241 }
 0x295   :  { %v247_v46 = vsel %vm193_vm2, %v242_v45, 0  ;;  %2264 = vmatprep.subr.bf16.mxu1 %v2531_v15 }
 0x296   :  { %2259 = vmatpush3.bf16.xpose.msra.mxu0 %v247_v46 }
 0x297   :  { %2270 = vmatprep.subr.bf16.mxu0 %v2531_v15 }
 0x29b   :  { %2255 = vmatmul.mubr.msk.bf16.vlgmr.msra.gmra.mrb[0].mxu1 %vm193_vm2, %v2685_v39 }
 0x29c   :  { %2266 = vmatprep.mubr.msk.bf16.mxu1 %vm2532_vm1, %v2531_v15 }
 0x29d   :  { %2261 = vmatmul.mubr.msk.bf16.vlgmr.msra.gmra.mrb[4].mxu0 %vm193_vm2, %v2687_v42 }
 0x29e   :  { %2272 = vmatprep.mubr.msk.bf16.mxu0 %vm2532_vm1, %v2531_v15 }
 0x36e   :  { %v234_v47 = vpop.f32.mrb[0].mxu1 }
 0x36f   :  { %v289_v49 = vmul.f32 0.25, %v234_v47  ;;  %v2256_v50 = vpop.f32.mrb[1].mxu1 }
 0x370   :  { %v237_v51 = vpop.f32.mrb[2].mxu1  ;;  %v283_v52 = vpop.f32.mrb[4].mxu0 }
 0x371   :  { %v290_v54 = vmul.f32 0.25, %v283_v52  ;;  %v2257_v55 = vpop.f32.mrb[3].mxu1  ;;  %v2262_v56 = vpop.f32.mrb[5].mxu0  ;;  %v303_v57 = vadd.f32 %v2708_v48, %v289_v49 }
 0x372   :  { %v286_v58 = vpop.f32.mrb[6].mxu0 }
 0x373   :  { %v2263_v59 = vpop.f32.mrb[7].mxu0  ;;  %v306_v60 = vsel %vm305_vm3, %v303_v57, -inf  ;;  %v304_v61 = vadd.f32 %v2713_v53, %v290_v54 }
 0x374   :  { %307 = vmax.xlane.f32.xlu1 %v306_v60 }
 0x375   :  { %v309_v62 = vsel %vm305_vm3, %v304_v61, -inf }
 0x376   :  { %310 = vmax.xlane.f32.xlu0 %v309_v62 }
 0x385   :  { %379 = vrot.lane.b32.xlu1 %v2687_v42, %s2534_s5 }
 0x389   :  { %430 = vrot.lane.b32.xlu1 %v2685_v39, %s2535_s1 }
 0x401   :  { %v308_v63 = vpop.xlane.xlu1 %307 }
 0x402   :  { %v312_v0 = vsub.f32 %v303_v57, %v308_v63 }
 0x403   :  { %v311_v1 = vpop.xlane.xlu0 %310 }
 0x404   :  { %v314_v2 = vmul.f32 1.442695, %v312_v0  ;;  %v313_v3 = vsub.f32 %v304_v61, %v311_v1 }
 0x405   :  { %v380_v4 = vpop.permute.xlu1 %379 }
 0x406   :  { %2471 = vpow2.f32 %v314_v2  ;;  %v316_v5 = vmul.f32 1.442695, %v313_v3  ;;  %v385_v6 = vsel %vm335_vm4, %v380_v4, 0 }
 0x407   :  { %2271 = vmatpush3.bf16.msra.mxu0 %v385_v6 }
 0x408   :  { %2473 = vpow2.f32 %v316_v5  ;;  %2282 = vmatprep.subr.bf16.mxu0 %v2531_v15 }
 0x409   :  { %v431_v11 = vpop.permute.xlu1 %430 }
 0x40a   :  { %v436_v23 = vsel %vm193_vm2, %v431_v11, 0 }
 0x410   :  { %v2472_v7 = vpop.eup %2471 }
 0x411   :  { %v318_v8 = vsel %vm305_vm3, %v2472_v7, 0.0 }
 0x412   :  { %v2474_v9 = vpop.eup %2473  ;;  %319 = vadd.xlane.f32.xlu0 %v318_v8 }
 0x413   :  { %v321_v10 = vsel %vm305_vm3, %v2474_v9, 0.0 }
 0x414   :  { %322 = vadd.xlane.f32.xlu1 %v321_v10 }
 0x425   :  { %480 = vrot.lane.b32.xlu1 %v2687_v42, %s2535_s1 }
 0x428   :  { %330 = vrot.lane.b32.xlu0 %v2685_v39, %s2534_s5 }
 0x429   :  { %478 = vrot.lane.b32.xlu1 %v2687_v42, %s2536_s29 }
 0x42c   :  { %428 = vrot.lane.b32.xlu0 %v2685_v39, %s2536_s29 }
 0x49f   :  { %v320_v12 = vpop.xlane.xlu0 %319 }
 0x4a0   :  { %2475 = vrcp.f32 %v320_v12 }
 0x4a1   :  { %v323_v13 = vpop.xlane.xlu1 %322 }
 0x4a2   :  { %2477 = vrcp.f32 %v323_v13 }
 0x4a3   :  { %v331_v14 = vpop.permute.xlu0 %330 }
 0x4a4   :  { %v337_v16 = vsel %vm335_vm4, %v331_v14, 0  ;;  %v2446_v14 = vld [vmem:[%s3070_s6 + $0x8] sm:$0xff]  }
 0x4a5   :  { %2265 = vmatpush3.bf16.msra.mxu1 %v337_v16  ;;  %v481_v22 = vpop.permute.xlu1 %480 }
 0x4a6   :  { %2276 = vmatprep.subr.bf16.mxu1 %v2531_v15  ;;  %v486_v25 = vsel %vm193_vm2, %v481_v22, 0 }
 0x4a7   :  { %v429_v26 = vpop.permute.xlu0 %428 }
 0x4a9   :  { %v479_v27 = vpop.permute.xlu1 %478 }
 0x4aa   :  { %v2476_v17 = vpop.eup %2475 }
 0x4ab   :  { %v325_v18 = vmul.f32 %v2476_v17, %v2472_v7 }
 0x4ac   :  { %v2478_v19 = vpop.eup %2477 }
 0x4ad   :  { %v327_v20 = vmul.f32 %v2478_v19, %v2474_v9  ;;  %v328_v21 = vpack.c.bf16 %v325_v18, %v325_v18 }
 0x4af   :  { %2267 = vmatmul.mubr.msk.bf16.vlgmr.msra.gmra.mrb[4].mxu1 %vm305_vm3, %v328_v21  ;;  %v329_v24 = vpack.c.bf16 %v327_v20, %v327_v20 }
 0x4b0   :  { %2277 = vmatpush3.bf16.xpose.msra.mxu1 %v436_v23  ;;  %2278 = vmatprep.mubr.msk.bf16.mxu1 %vm2532_vm1, %v2531_v15 }
 0x4b1   :  { %2273 = vmatmul.mubr.msk.bf16.vlgmr.msra.gmra.mrb[8].mxu0 %vm305_vm3, %v329_v24  ;;  %2288 = vmatprep.subr.bf16.mxu1 %v2531_v15 }
 0x4b2   :  { %2283 = vmatpush3.bf16.xpose.msra.mxu0 %v486_v25  ;;  %2284 = vmatprep.mubr.msk.bf16.mxu0 %vm2532_vm1, %v2531_v15 }
 0x4b3   :  { %2294 = vmatprep.subr.bf16.mxu0 %v2531_v15 }
 0x4b7   :  { %2279 = vmatmul.mubr.msk.bf16.vlgmr.msra.gmra.mrb[8].mxu1 %vm193_vm2, %v429_v26 }
 0x4b8   :  { %2290 = vmatprep.mubr.msk.bf16.mxu1 %vm2532_vm1, %v2531_v15 }
 0x4b9   :  { %2285 = vmatmul.mubr.msk.bf16.vlgmr.msra.gmra.mrb[12].mxu0 %vm193_vm2, %v479_v27 }
 0x4ba   :  { %2296 = vmatprep.mubr.msk.bf16.mxu0 %vm2532_vm1, %v2531_v15 }
 0x582   :  { %v2753_v28 = vpop.f32.mrb[4].mxu1 }
 0x583   :  { %v2268_v29 = vpop.f32.mrb[5].mxu1 }
 0x584   :  { %v376_v30 = vpop.f32.mrb[6].mxu1  ;;  %v2755_v33 = vpop.f32.mrb[8].mxu0 }
 0x585   :  { %v427_v34 = vpack.c.bf16 %v2755_v33, %v2753_v28  ;;  %v2269_v35 = vpop.f32.mrb[7].mxu1  ;;  %v2274_v36 = vpop.f32.mrb[9].mxu0  ;;  %v2094_v30 = vld [vmem:[%s3071_s7] ss:$0 sm:$0xff] }
 0x586   :  { %v424_v37 = vpop.f32.mrb[10].mxu0 }
 0x587   :  { %v2275_v38 = vpop.f32.mrb[11].mxu0 }
 0x58a   :  { %v472_v40 = vpop.f32.mrb[8].mxu1 }
 0x58b   :  { %v528_v41 = vmul.f32 0.25, %v472_v40  ;;  %v2280_v43 = vpop.f32.mrb[9].mxu1 }
 0x58c   :  { %v475_v44 = vpop.f32.mrb[10].mxu1  ;;  %v522_v45 = vpop.f32.mrb[12].mxu0 }
 0x58d   :  { %v529_v46 = vmul.f32 0.25, %v522_v45  ;;  %v2281_v47 = vpop.f32.mrb[11].mxu1  ;;  %v2286_v49 = vpop.f32.mrb[13].mxu0  ;;  %v530_v50 = vadd.f32 %v2708_v48, %v528_v41 }
 0x58e   :  { %v525_v51 = vpop.f32.mrb[14].mxu0 }
 0x58f   :  { %v2287_v52 = vpop.f32.mrb[15].mxu0  ;;  %v532_v54 = vsel %vm305_vm3, %v530_v50, -inf  ;;  %v531_v55 = vadd.f32 %v2713_v53, %v529_v46 }
 0x590   :  { %533 = vmax.xlane.f32.xlu0 %v532_v54 }
 0x591   :  { %v535_v56 = vsel %vm305_vm3, %v531_v55, -inf }
 0x592   :  { %536 = vmax.xlane.f32.xlu1 %v535_v56 }
 0x5a3   :  { %604 = vrot.lane.b32.xlu1 %v2687_v42, %s2537_s30 }
 0x61d   :  { %v534_v57 = vpop.xlane.xlu0 %533 }
 0x61e   :  { %v538_v58 = vsub.f32 %v530_v50, %v534_v57  ;;  %v2448_v57 = vld [vmem:[%s3072_s10 + $0x8] sm:$0xff]  }
 0x61f   :  { %v537_v59 = vpop.xlane.xlu1 %536 }
 0x620   :  { %v540_v60 = vmul.f32 1.442695, %v538_v58  ;;  %v539_v61 = vsub.f32 %v531_v55, %v537_v59 }
 0x622   :  { %2479 = vpow2.f32 %v540_v60  ;;  %v542_v62 = vmul.f32 1.442695, %v539_v61 }
 0x623   :  { %v605_v63 = vpop.permute.xlu1 %604 }
 0x624   :  { %2481 = vpow2.f32 %v542_v62  ;;  %v610_v0 = vsel %vm335_vm4, %v605_v63, 0 }
 0x625   :  { %2295 = vmatpush3.bf16.msra.mxu0 %v610_v0 }
 0x626   :  { %2306 = vmatprep.subr.bf16.mxu0 %v2531_v15 }
 0x62c   :  { %v2480_v1 = vpop.eup %2479 }
 0x62d   :  { %v544_v2 = vsel %vm305_vm3, %v2480_v1, 0.0 }
 0x62e   :  { %v2482_v3 = vpop.eup %2481  ;;  %545 = vadd.xlane.f32.xlu0 %v544_v2 }
 0x62f   :  { %v547_v42 = vsel %vm305_vm3, %v2482_v3, 0.0 }
 0x632   :  { %548 = vadd.xlane.f32.xlu0 %v547_v42 }
 0x648   :  { %556 = vrot.lane.b32.xlu0 %v2685_v39, %s2537_s30  ;;  %v2445_v39 = vld [vmem:[%s3070_s6] sm:$0xff]  }
 0x6bb   :  { %v546_v4 = vpop.xlane.xlu0 %545 }
 0x6bc   :  { %2483 = vrcp.f32 %v546_v4 }
 0x6bf   :  { %v549_v5 = vpop.xlane.xlu0 %548 }
 0x6c0   :  { %2485 = vrcp.f32 %v549_v5  ;;  %v2096_v5 = vld [vmem:[%s3074_s9] ss:$0 sm:$0xff] }
 0x6c3   :  { %v557_v6 = vpop.permute.xlu0 %556 }
 0x6c4   :  { %v562_v7 = vsel %vm335_vm4, %v557_v6, 0 }
 0x6c5   :  { %2289 = vmatpush3.bf16.msra.mxu1 %v562_v7 }
 0x6c6   :  { %v2484_v8 = vpop.eup %2483  ;;  %2300 = vmatprep.subr.bf16.mxu1 %v2531_v15 }
 0x6c7   :  { %v551_v9 = vmul.f32 %v2484_v8, %v2480_v1  ;;  %v2095_v1 = vld [vmem:[%s3073_s8] ss:$0 sm:$0xff] }
 0x6c9   :  { %v554_v10 = vpack.c.bf16 %v551_v9, %v551_v9 }
 0x6ca   :  { %v2486_v11 = vpop.eup %2485 }
 0x6cb   :  { %v553_v12 = vmul.f32 %v2486_v11, %v2482_v3  ;;  %2291 = vmatmul.mubr.msk.bf16.vlgmr.msra.gmra.mrb[12].mxu1 %vm305_vm3, %v554_v10  ;;  %v2449_v10 = vld [vmem:[%s3075_s12] sm:$0xff]   ;;  %v2450_v11 = vld [vmem:[%s3075_s12 + $0x8] sm:$0xff]  }
 0x6cc   :  { %2302 = vmatprep.mubr.msk.bf16.mxu1 %vm2532_vm1, %v2531_v15  ;;  %2301 = vmatpush3.bf16.msra.mxu1 %v2446_v14 }
 0x6cd   :  { %v555_v13 = vpack.c.bf16 %v553_v12, %v553_v12  ;;  %2312 = vmatprep.subr.bf16.mxu1 %v2531_v15  ;;  %v2451_v12 = vld [vmem:[%s3075_s12 + $0x10] sm:$0xff]  }
 0x6cf   :  { %2297 = vmatmul.mubr.msk.bf16.vlgmr.msra.gmra.mrb[16].mxu0 %vm305_vm3, %v555_v13  ;;  %v2097_v13 = vld [vmem:[%s3076_s11] ss:$0 sm:$0xff] }
 0x6d0   :  { %2307 = vmatpush3.bf16.msra.mxu0 %v2445_v39  ;;  %2308 = vmatprep.mubr.msk.bf16.mxu0 %vm2532_vm1, %v2531_v15  ;;  %v2452_v39 = vld [vmem:[%s3075_s12 + $0x18] sm:$0xff]  }
 0x6d1   :  { %2320 = vmatprep.subr.bf16.mxu0 %v2531_v15 }
 0x6d7   :  { %2309 = vmatmul.mubr.msk.bf16.vlgmr.msra.gmra.mrb[20].mxu0 %vm193_vm2, %v427_v34 }
 0x6d8   :  { %2328 = vmatprep.mubr.msk.bf16.mxu0 %vm2532_vm1, %v2531_v15  ;;  %2321 = vmatpush3.bf16.msra.mxu0 %v2449_v10 }
 0x6d9   :  { %2322 = vmatprep.subr.bf16.mxu0 %v2531_v15 }
 0x6dc   :  { %2323 = vmatpush3.bf16.msra.mxu0 %v2450_v11 }
 0x6dd   :  { %2324 = vmatprep.subr.bf16.mxu0 %v2531_v15 }
 0x6e0   :  { %2325 = vmatpush3.bf16.msra.mxu0 %v2451_v12 }
 0x6e1   :  { %2326 = vmatprep.subr.bf16.mxu0 %v2531_v15 }
 0x6e4   :  { %2327 = vmatpush3.bf16.msra.mxu0 %v2452_v39 }
 0x6e5   :  { %2346 = vmatprep.subr.bf16.mxu0 %v2531_v15 }
 0x79e   :  { %v598_v16 = vpop.f32.mrb[12].mxu1 }
 0x79f   :  { %v2292_v17 = vpop.f32.mrb[13].mxu1 }
 0x7a0   :  { %v601_v18 = vpop.f32.mrb[14].mxu1 }
 0x7a1   :  { %v2293_v19 = vpop.f32.mrb[15].mxu1 }
 0x7a2   :  { %v646_v20 = vpop.f32.mrb[16].mxu0 }
 0x7a3   :  { %v652_v21 = vpack.c.bf16 %v646_v20, %v598_v16  ;;  %v2298_v22 = vpop.f32.mrb[17].mxu0 }
 0x7a4   :  { %v649_v23 = vpop.f32.mrb[18].mxu0 }
 0x7a5   :  { %v2299_v24 = vpop.f32.mrb[19].mxu0  ;;  %2303 = vmatmul.mubr.msk.bf16.vlgmr.msra.gmra.mrb[16].mxu1 %vm193_vm2, %v652_v21 }
 0x7a6   :  { %2316 = vmatprep.mubr.msk.bf16.mxu1 %vm2532_vm1, %v2531_v15 }
 0x7aa   :  { %v746_v25 = vpop.f32.mrb[20].mxu0 }
 0x7ab   :  { %v2310_v26 = vpop.f32.mrb[21].mxu0 }
 0x7ac   :  { %v749_v27 = vpop.f32.mrb[22].mxu0 }
 0x7ad   :  { %v2311_v28 = vpop.f32.mrb[23].mxu0 }
 0x878   :  { %v696_v29 = vpop.f32.mrb[16].mxu1 }
 0x879   :  { %v747_v33 = vadd.f32 %v746_v25, %v696_v29  ;;  %v2304_v34 = vpop.f32.mrb[17].mxu1 }
 0x87a   :  { %v699_v35 = vpop.f32.mrb[18].mxu1 }
 0x87b   :  { %v760_v36 = vadd.f32 %v2094_v30, %v747_v33  ;;  %v750_v37 = vadd.f32 %v749_v27, %v699_v35  ;;  %v2305_v38 = vpop.f32.mrb[19].mxu1 }
 0x87d   :  { %v761_v40 = vadd.f32 %v2094_v30, %v750_v37  ;;  %v762_v41 = vadd.f32 %v760_v36, %v2673_v31 }
 0x87f   :  { %v766_v43 = vsel %vm70_vm0, %v762_v41, 0.0  ;;  %v763_v44 = vadd.f32 %v761_v40, %v2675_v32  ;;  %v2447_v32 = vld [vmem:[%s3072_s10] sm:$0xff]  }
 0x880   :  { %767 = vadd.xlane.f32.xlu1 %v766_v43  ;;  %2313 = vmatpush3.bf16.msra.mxu1 %v2447_v32 }
 0x881   :  { %v769_v45 = vsel %vm70_vm0, %v763_v44, 0.0  ;;  %2314 = vmatprep.subr.bf16.mxu1 %v2531_v15 }
 0x882   :  { %770 = vadd.xlane.f32.xlu0 %v769_v45 }
 0x884   :  { %2315 = vmatpush3.bf16.msra.mxu1 %v2448_v57 }
 0x885   :  { %2332 = vmatprep.subr.bf16.mxu1 %v2531_v15 }
 0x90d   :  { %v768_v46 = vpop.xlane.xlu1 %767 }
 0x90e   :  { %v772_v47 = vmul.f32 0.03125, %v768_v46 }
 0x90f   :  { %v771_v49 = vpop.xlane.xlu0 %770 }
 0x910   :  { %v774_v50 = vsub.f32 %v762_v41, %v772_v47  ;;  %v773_v51 = vmul.f32 0.03125, %v771_v49 }
 0x912   :  { %v775_v52 = vsub.f32 %v763_v44, %v773_v51  ;;  %v776_v54 = vmul.f32 %v774_v50, %v774_v50  ;;  %v2101_v44 = vld [vmem:[%s3077_s13] ss:$0 sm:$0xff] }
 0x914   :  { %v778_v55 = vsel %vm70_vm0, %v776_v54, 0.0  ;;  %v777_v56 = vmul.f32 %v775_v52, %v775_v52 }
 0x915   :  { %779 = vadd.xlane.f32.xlu0 %v778_v55 }
 0x916   :  { %v781_v31 = vsel %vm70_vm0, %v777_v56, 0.0 }
 0x917   :  { %782 = vadd.xlane.f32.xlu1 %v781_v31 }
 0x9a2   :  { %v780_v58 = vpop.xlane.xlu0 %779 }
 0x9a3   :  { %v784_v59 = vmul.f32 0.03125, %v780_v58 }
 0x9a4   :  { %v783_v60 = vpop.xlane.xlu1 %782 }
 0x9a5   :  { %v786_v61 = vadd.f32 1e-12, %v784_v59  ;;  %v785_v62 = vmul.f32 0.03125, %v783_v60 }
 0x9a7   :  { %2487 = vrsqrt.f32 %v786_v61  ;;  %v787_v63 = vadd.f32 1e-12, %v785_v62 }
 0x9a9   :  { %2489 = vrsqrt.f32 %v787_v63 }
 0x9b1   :  { %v2488_v0 = vpop.eup %2487 }
 0x9b2   :  { %v790_v2 = vmul.f32 %v2488_v0, %v774_v50 }
 0x9b3   :  { %v2490_v3 = vpop.eup %2489 }
 0x9b4   :  { %v798_v42 = vmul.f32 %v2095_v1, %v790_v2  ;;  %v791_v4 = vmul.f32 %v2490_v3, %v775_v52  ;;  %v2454_v2 = vld [vmem:[%s3094_s26 + $0x18] sm:$0xff]  }
 0x9b6   :  { %v799_v6 = vmul.f32 %v2095_v1, %v791_v4  ;;  %v806_v7 = vadd.f32 %v2096_v5, %v798_v42  ;;  %v2453_v1 = vld [vmem:[%s3094_s26 + $0x10] sm:$0xff]  }
 0x9b8   :  { %v807_v8 = vadd.f32 %v2096_v5, %v799_v6 }
 0x9ba   :  { %v812_v9 = vpack.c.bf16 %v807_v8, %v806_v7 }
 0x9bc   :  { %2317 = vmatmul.mubr.msk.bf16.vlgmr.msra.gmra.mrb[20].mxu1 %vm70_vm0, %v812_v9  ;;  %v2107_v9 = vld [vmem:[%s3078_s14] ss:$0 sm:$0xff] }
 0x9bd   :  { %2336 = vmatprep.mubr.msk.bf16.mxu1 %vm2532_vm1, %v2531_v15  ;;  %2333 = vmatpush3.bf16.msra.mxu1 %v2453_v1 }
 0x9be   :  { %2334 = vmatprep.subr.bf16.mxu1 %v2531_v15 }
 0x9c1   :  { %2335 = vmatpush3.bf16.msra.mxu1 %v2454_v2 }
 0x9c2   :  { %2340 = vmatprep.subr.bf16.mxu1 %v2531_v15 }
 0xa8f   :  { %v869_v14 = vpop.f32.mrb[20].mxu1 }
 0xa90   :  { %v870_v16 = vadd.f32 %v2097_v13, %v869_v14  ;;  %v2318_v17 = vpop.f32.mrb[21].mxu1 }
 0xa91   :  { %v872_v18 = vpop.f32.mrb[22].mxu1 }
 0xa92   :  { %v876_v19 = vmul.f32 %v870_v16, %v870_v16  ;;  %v873_v20 = vadd.f32 %v2097_v13, %v872_v18  ;;  %v2319_v21 = vpop.f32.mrb[23].mxu1  ;;  %v2108_v13 = vld [vmem:[%s3079_s15] ss:$0 sm:$0xff] }
 0xa94   :  { %v878_v22 = vmul.f32 %v876_v19, %v870_v16  ;;  %v877_v23 = vmul.f32 %v873_v20, %v873_v20  ;;  %v2118_v19 = vld [vmem:[%s3097_s24 + $0x1] ss:$0 sm:$0xff] }
 0xa96   :  { %v880_v24 = vmul.f32 0.044715, %v878_v22  ;;  %v879_v25 = vmul.f32 %v877_v23, %v873_v20 }
 0xa98   :  { %v882_v26 = vadd.f32 %v880_v24, %v870_v16  ;;  %v881_v27 = vmul.f32 0.044715, %v879_v25 }
 0xa9a   :  { %v884_v28 = vmul.f32 0.7978846, %v882_v26  ;;  %v883_v29 = vadd.f32 %v881_v27, %v873_v20 }
 0xa9c   :  { %2491 = vtanh.f32 %v884_v28  ;;  %v885_v30 = vmul.f32 0.7978846, %v883_v29 }
 0xa9e   :  { %2493 = vtanh.f32 %v885_v30 }
 0xaa6   :  { %v2492_v33 = vpop.eup %2491 }
 0xaa7   :  { %v888_v34 = vadd.f32 1.0, %v2492_v33 }
 0xaa8   :  { %v2494_v35 = vpop.eup %2493 }
 0xaa9   :  { %v890_v36 = vmul.f32 0.5, %v888_v34  ;;  %v889_v37 = vadd.f32 1.0, %v2494_v35 }
 0xaab   :  { %v891_v38 = vmul.f32 0.5, %v889_v37  ;;  %v892_v40 = vmul.f32 %v890_v36, %v870_v16 }
 0xaad   :  { %v893_v41 = vmul.f32 %v891_v38, %v873_v20 }
 0xaaf   :  { %v902_v43 = vpack.c.bf16 %v893_v41, %v892_v40 }
 0xab1   :  { %2329 = vmatmul.mubr.msk.bf16.vlgmr.msra.gmra.mrb[24].mxu0 %vm934_vm5, %v902_v43 }
 0xab2   :  { %2348 = vmatprep.mubr.msk.bf16.mxu0 %vm2532_vm1, %v2531_v15 }
 0xb84   :  { %v972_v45 = vpop.f32.mrb[24].mxu0 }
 0xb85   :  { %v973_v46 = vadd.f32 %v2101_v44, %v972_v45  ;;  %v2330_v47 = vpop.f32.mrb[25].mxu0 }
 0xb86   :  { %v975_v49 = vpop.f32.mrb[26].mxu0 }
 0xb87   :  { %v976_v50 = vadd.f32 %v2101_v44, %v975_v49  ;;  %v2331_v51 = vpop.f32.mrb[27].mxu0  ;;  %v979_v52 = vadd.f32 %v973_v46, %v806_v7 }
 0xb89   :  { %v983_v54 = vsel %vm70_vm0, %v979_v52, 0.0  ;;  %v980_v55 = vadd.f32 %v976_v50, %v807_v8 }
 0xb8a   :  { %984 = vadd.xlane.f32.xlu0 %v983_v54 }
 0xb8b   :  { %v986_v56 = vsel %vm70_vm0, %v980_v55, 0.0 }
 0xb8c   :  { %987 = vadd.xlane.f32.xlu1 %v986_v56 }
 0xc17   :  { %v985_v31 = vpop.xlane.xlu0 %984 }
 0xc18   :  { %v989_v32 = vmul.f32 0.03125, %v985_v31 }
 0xc19   :  { %v988_v57 = vpop.xlane.xlu1 %987 }
 0xc1a   :  { %v991_v58 = vsub.f32 %v979_v52, %v989_v32  ;;  %v990_v59 = vmul.f32 0.03125, %v988_v57 }
 0xc1c   :  { %v992_v60 = vsub.f32 %v980_v55, %v990_v59  ;;  %v993_v61 = vmul.f32 %v991_v58, %v991_v58 }
 0xc1e   :  { %v995_v62 = vsel %vm70_vm0, %v993_v61, 0.0  ;;  %v994_v63 = vmul.f32 %v992_v60, %v992_v60 }
 0xc1f   :  { %996 = vadd.xlane.f32.xlu0 %v995_v62 }
 0xc20   :  { %v998_v0 = vsel %vm70_vm0, %v994_v63, 0.0 }
 0xc21   :  { %999 = vadd.xlane.f32.xlu1 %v998_v0 }
 0xcac   :  { %v997_v3 = vpop.xlane.xlu0 %996 }
 0xcad   :  { %v1001_v42 = vmul.f32 0.03125, %v997_v3 }
 0xcae   :  { %v1000_v4 = vpop.xlane.xlu1 %999 }
 0xcaf   :  { %v1003_v5 = vadd.f32 1e-12, %v1001_v42  ;;  %v1002_v6 = vmul.f32 0.03125, %v1000_v4 }
 0xcb1   :  { %2495 = vrsqrt.f32 %v1003_v5  ;;  %v1004_v7 = vadd.f32 1e-12, %v1002_v6 }
 0xcb3   :  { %2497 = vrsqrt.f32 %v1004_v7 }
 0xcbb   :  { %v2496_v8 = vpop.eup %2495 }
 0xcbc   :  { %v1007_v10 = vmul.f32 %v2496_v8, %v991_v58 }
 0xcbd   :  { %v2498_v11 = vpop.eup %2497 }
 0xcbe   :  { %v1015_v12 = vmul.f32 %v2107_v9, %v1007_v10  ;;  %v1008_v39 = vmul.f32 %v2498_v11, %v992_v60 }
 0xcc0   :  { %v1016_v14 = vmul.f32 %v2107_v9, %v1008_v39  ;;  %v2865_v16 = vadd.f32 %v2108_v13, %v1015_v12 }
 0xcc2   :  { %v2867_v17 = vadd.f32 %v2108_v13, %v1016_v14 }
 0xcc4   :  { %v1035_v18 = vpack.c.bf16 %v2867_v17, %v2865_v16 }
 0xcc6   :  { %2337 = vmatmul.mubr.msk.bf16.vlgmr.msra.gmra.mrb[24].mxu1 %vm70_vm0, %v1035_v18 }
 0xcc7   :  { %2342 = vmatprep.mubr.msk.bf16.mxu1 %vm2532_vm1, %v2531_v15 }
 0xd99   :  { %v1093_v20 = vpop.f32.mrb[24].mxu1 }
 0xd9a   :  { %v1094_v21 = vadd.f32 %v2118_v19, %v1093_v20  ;;  %v2338_v22 = vpop.f32.mrb[25].mxu1 }
 0xd9b   :  { %v1096_v23 = vpop.f32.mrb[26].mxu1 }
 0xd9c   :  { %v2877_v24 = vpack.c.bf16 %v1094_v21, %v1094_v21  ;;  %v1097_v25 = vadd.f32 %v2118_v19, %v1096_v23  ;;  %v2339_v26 = vpop.f32.mrb[27].mxu1 }
 0xd9e   :  { %v2879_v27 = vpack.c.bf16 %v1097_v25, %v1097_v25  ;;  %1103 = vrot.lane.b32.xlu0 %v2877_v24, %s2533_s2 }
 0xda0   :  { %1152 = vrot.lane.b32.xlu1 %v2879_v27, %s2533_s2 }
 0xe10   :  { %v1104_v28 = vpop.permute.xlu0 %1103 }
 0xe11   :  { %v1109_v29 = vsel %vm193_vm2, %v1104_v28, 0 }
 0xe12   :  { %2341 = vmatpush3.bf16.xpose.msra.mxu1 %v1109_v29  ;;  %v1153_v30 = vpop.permute.xlu1 %1152 }
 0xe13   :  { %v1158_v33 = vsel %vm193_vm2, %v1153_v30, 0  ;;  %2352 = vmatprep.subr.bf16.mxu1 %v2531_v15 }
 0xe14   :  { %2347 = vmatpush3.bf16.xpose.msra.mxu0 %v1158_v33 }
 0xe15   :  { %2358 = vmatprep.subr.bf16.mxu0 %v2531_v15 }
 0xe19   :  { %2343 = vmatmul.mubr.msk.bf16.vlgmr.msra.gmra.mrb[28].mxu1 %vm193_vm2, %v2877_v24 }
 0xe1a   :  { %2354 = vmatprep.mubr.msk.bf16.mxu1 %vm2532_vm1, %v2531_v15 }
 0xe1b   :  { %2349 = vmatmul.mubr.msk.bf16.vlgmr.msra.gmra.mrb[28].mxu0 %vm193_vm2, %v2879_v27 }
 0xe1c   :  { %2360 = vmatprep.mubr.msk.bf16.mxu0 %vm2532_vm1, %v2531_v15 }
 0xeec   :  { %v1145_v34 = vpop.f32.mrb[28].mxu1 }
 0xeed   :  { %v1200_v35 = vmul.f32 0.25, %v1145_v34  ;;  %v2344_v36 = vpop.f32.mrb[29].mxu1 }
 0xeee   :  { %v1148_v37 = vpop.f32.mrb[30].mxu1  ;;  %v1194_v38 = vpop.f32.mrb[28].mxu0 }
 0xeef   :  { %v1201_v40 = vmul.f32 0.25, %v1194_v38  ;;  %v2345_v41 = vpop.f32.mrb[31].mxu1  ;;  %v2350_v43 = vpop.f32.mrb[29].mxu0  ;;  %v1202_v44 = vadd.f32 %v2708_v48, %v1200_v35 }
 0xef0   :  { %v1197_v45 = vpop.f32.mrb[30].mxu0 }
 0xef1   :  { %v2351_v46 = vpop.f32.mrb[31].mxu0  ;;  %v1204_v47 = vsel %vm305_vm3, %v1202_v44, -inf  ;;  %v1203_v49 = vadd.f32 %v2713_v53, %v1201_v40 }
 0xef2   :  { %1205 = vmax.xlane.f32.xlu1 %v1204_v47 }
 0xef3   :  { %v1207_v50 = vsel %vm305_vm3, %v1203_v49, -inf }
 0xef4   :  { %1208 = vmax.xlane.f32.xlu0 %v1207_v50 }
 0xf03   :  { %1276 = vrot.lane.b32.xlu1 %v2879_v27, %s2534_s5 }
 0xf07   :  { %1327 = vrot.lane.b32.xlu1 %v2877_v24, %s2535_s1 }
 0xf7f   :  { %v1206_v51 = vpop.xlane.xlu1 %1205 }
 0xf80   :  { %v1210_v52 = vsub.f32 %v1202_v44, %v1206_v51 }
 0xf81   :  { %v1209_v54 = vpop.xlane.xlu0 %1208 }
 0xf82   :  { %v1212_v55 = vmul.f32 1.442695, %v1210_v52  ;;  %v1211_v56 = vsub.f32 %v1203_v49, %v1209_v54 }
 0xf83   :  { %v1277_v31 = vpop.permute.xlu1 %1276 }
 0xf84   :  { %2499 = vpow2.f32 %v1212_v55  ;;  %v1214_v32 = vmul.f32 1.442695, %v1211_v56  ;;  %v1282_v57 = vsel %vm335_vm4, %v1277_v31, 0 }
 0xf85   :  { %2359 = vmatpush3.bf16.msra.mxu0 %v1282_v57 }
 0xf86   :  { %2501 = vpow2.f32 %v1214_v32  ;;  %2370 = vmatprep.subr.bf16.mxu0 %v2531_v15 }
 0xf87   :  { %v1328_v62 = vpop.permute.xlu1 %1327 }
 0xf88   :  { %v1333_v8 = vsel %vm193_vm2, %v1328_v62, 0 }
 0xf8e   :  { %v2500_v58 = vpop.eup %2499 }
 0xf8f   :  { %v1216_v59 = vsel %vm305_vm3, %v2500_v58, 0.0 }
 0xf90   :  { %v2502_v60 = vpop.eup %2501  ;;  %1217 = vadd.xlane.f32.xlu0 %v1216_v59 }
 0xf91   :  { %v1219_v61 = vsel %vm305_vm3, %v2502_v60, 0.0 }
 0xf92   :  { %1220 = vadd.xlane.f32.xlu1 %v1219_v61 }
 0xfa3   :  { %1377 = vrot.lane.b32.xlu1 %v2879_v27, %s2535_s1 }
 0xfa6   :  { %1228 = vrot.lane.b32.xlu0 %v2877_v24, %s2534_s5 }
 0xfa7   :  { %1375 = vrot.lane.b32.xlu1 %v2879_v27, %s2536_s29 }
 0xfaa   :  { %1325 = vrot.lane.b32.xlu0 %v2877_v24, %s2536_s29 }
0x101d   :  { %v1218_v63 = vpop.xlane.xlu0 %1217 }
0x101e   :  { %2503 = vrcp.f32 %v1218_v63  ;;  %v2456_v63 = vld [vmem:[%s3070_s6 + $0x18] sm:$0xff]  }
0x101f   :  { %v1221_v0 = vpop.xlane.xlu1 %1220 }
0x1020   :  { %2505 = vrcp.f32 %v1221_v0 }
0x1021   :  { %v1229_v1 = vpop.permute.xlu0 %1228 }
0x1022   :  { %v1234_v2 = vsel %vm335_vm4, %v1229_v1, 0 }
0x1023   :  { %2353 = vmatpush3.bf16.msra.mxu1 %v1234_v2  ;;  %v1378_v7 = vpop.permute.xlu1 %1377 }
0x1024   :  { %2364 = vmatprep.subr.bf16.mxu1 %v2531_v15  ;;  %v1383_v10 = vsel %vm193_vm2, %v1378_v7, 0 }
0x1025   :  { %v1326_v11 = vpop.permute.xlu0 %1325 }
0x1027   :  { %v1376_v12 = vpop.permute.xlu1 %1375 }
0x1028   :  { %v2504_v3 = vpop.eup %2503 }
0x1029   :  { %v1223_v42 = vmul.f32 %v2504_v3, %v2500_v58 }
0x102a   :  { %v2506_v4 = vpop.eup %2505 }
0x102b   :  { %v1225_v5 = vmul.f32 %v2506_v4, %v2502_v60  ;;  %v1226_v6 = vpack.c.bf16 %v1223_v42, %v1223_v42 }
0x102d   :  { %2355 = vmatmul.mubr.msk.bf16.vlgmr.msra.gmra.mrb[32].mxu1 %vm305_vm3, %v1226_v6  ;;  %v1227_v9 = vpack.c.bf16 %v1225_v5, %v1225_v5 }
0x102e   :  { %2365 = vmatpush3.bf16.xpose.msra.mxu1 %v1333_v8  ;;  %2366 = vmatprep.mubr.msk.bf16.mxu1 %vm2532_vm1, %v2531_v15 }
0x102f   :  { %2361 = vmatmul.mubr.msk.bf16.vlgmr.msra.gmra.mrb[32].mxu0 %vm305_vm3, %v1227_v9  ;;  %2376 = vmatprep.subr.bf16.mxu1 %v2531_v15 }
0x1030   :  { %2371 = vmatpush3.bf16.xpose.msra.mxu0 %v1383_v10  ;;  %2372 = vmatprep.mubr.msk.bf16.mxu0 %vm2532_vm1, %v2531_v15 }
0x1031   :  { %2382 = vmatprep.subr.bf16.mxu0 %v2531_v15 }
0x1035   :  { %2367 = vmatmul.mubr.msk.bf16.vlgmr.msra.gmra.mrb[36].mxu1 %vm193_vm2, %v1326_v11 }
0x1036   :  { %2378 = vmatprep.mubr.msk.bf16.mxu1 %vm2532_vm1, %v2531_v15 }
0x1037   :  { %2373 = vmatmul.mubr.msk.bf16.vlgmr.msra.gmra.mrb[36].mxu0 %vm193_vm2, %v1376_v12 }
0x1038   :  { %2384 = vmatprep.mubr.msk.bf16.mxu0 %vm2532_vm1, %v2531_v15 }
0x1100   :  { %v2935_v39 = vpop.f32.mrb[32].mxu1 }
0x1101   :  { %v2356_v13 = vpop.f32.mrb[33].mxu1 }
0x1102   :  { %v1273_v14 = vpop.f32.mrb[34].mxu1  ;;  %v2937_v18 = vpop.f32.mrb[32].mxu0 }
0x1103   :  { %v1324_v19 = vpack.c.bf16 %v2937_v18, %v2935_v39  ;;  %v2357_v20 = vpop.f32.mrb[35].mxu1  ;;  %v2362_v21 = vpop.f32.mrb[33].mxu0  ;;  %v2135_v39 = vld [vmem:[%s3071_s7 + $0x1] ss:$0 sm:$0xff] }
0x1104   :  { %v1321_v22 = vpop.f32.mrb[34].mxu0 }
0x1105   :  { %v2363_v23 = vpop.f32.mrb[35].mxu0 }
0x1108   :  { %v1369_v25 = vpop.f32.mrb[36].mxu1 }
0x1109   :  { %v1425_v26 = vmul.f32 0.25, %v1369_v25  ;;  %v2368_v28 = vpop.f32.mrb[37].mxu1 }
0x110a   :  { %v1372_v29 = vpop.f32.mrb[38].mxu1  ;;  %v1419_v30 = vpop.f32.mrb[36].mxu0 }
0x110b   :  { %v1426_v33 = vmul.f32 0.25, %v1419_v30  ;;  %v2369_v34 = vpop.f32.mrb[39].mxu1  ;;  %v2374_v35 = vpop.f32.mrb[37].mxu0  ;;  %v1427_v36 = vadd.f32 %v2708_v48, %v1425_v26 }
0x110c   :  { %v1422_v37 = vpop.f32.mrb[38].mxu0 }
0x110d   :  { %v2375_v38 = vpop.f32.mrb[39].mxu0  ;;  %v1429_v40 = vsel %vm305_vm3, %v1427_v36, -inf  ;;  %v1428_v41 = vadd.f32 %v2713_v53, %v1426_v33 }
0x110e   :  { %1430 = vmax.xlane.f32.xlu0 %v1429_v40 }
0x110f   :  { %v1432_v43 = vsel %vm305_vm3, %v1428_v41, -inf }
0x1110   :  { %1433 = vmax.xlane.f32.xlu1 %v1432_v43 }
0x1121   :  { %1501 = vrot.lane.b32.xlu1 %v2879_v27, %s2537_s30 }
0x119b   :  { %v1431_v44 = vpop.xlane.xlu0 %1430 }
0x119c   :  { %v1435_v45 = vsub.f32 %v1427_v36, %v1431_v44 }
0x119d   :  { %v1434_v46 = vpop.xlane.xlu1 %1433 }
0x119e   :  { %v1437_v47 = vmul.f32 1.442695, %v1435_v45  ;;  %v1436_v49 = vsub.f32 %v1428_v41, %v1434_v46  ;;  %v2458_v41 = vld [vmem:[%s3072_s10 + $0x18] sm:$0xff]  }
0x11a0   :  { %2507 = vpow2.f32 %v1437_v47  ;;  %v1439_v48 = vmul.f32 1.442695, %v1436_v49 }
0x11a1   :  { %v1502_v50 = vpop.permute.xlu1 %1501 }
0x11a2   :  { %2509 = vpow2.f32 %v1439_v48  ;;  %v1507_v51 = vsel %vm335_vm4, %v1502_v50, 0  ;;  %v2138_v50 = vld [vmem:[%s3073_s8 + $0x1] ss:$0 sm:$0xff] }
0x11a3   :  { %2383 = vmatpush3.bf16.msra.mxu0 %v1507_v51 }
0x11a4   :  { %2394 = vmatprep.subr.bf16.mxu0 %v2531_v15 }
0x11aa   :  { %v2508_v53 = vpop.eup %2507 }
0x11ab   :  { %v1441_v52 = vsel %vm305_vm3, %v2508_v53, 0.0 }
0x11ac   :  { %v2510_v54 = vpop.eup %2509  ;;  %1442 = vadd.xlane.f32.xlu0 %v1441_v52 }
0x11ad   :  { %v1444_v27 = vsel %vm305_vm3, %v2510_v54, 0.0 }
0x11b0   :  { %1445 = vadd.xlane.f32.xlu0 %v1444_v27  ;;  %v2139_v27 = vld [vmem:[%s3074_s9 + $0x1] ss:$0 sm:$0xff] }
0x11c6   :  { %1453 = vrot.lane.b32.xlu0 %v2877_v24, %s2537_s30  ;;  %v2455_v24 = vld [vmem:[%s3070_s6 + $0x10] sm:$0xff]  }
0x1239   :  { %v1443_v55 = vpop.xlane.xlu0 %1442 }
0x123a   :  { %2511 = vrcp.f32 %v1443_v55 }
0x123d   :  { %v1446_v56 = vpop.xlane.xlu0 %1445 }
0x123e   :  { %2513 = vrcp.f32 %v1446_v56 }
0x1241   :  { %v1454_v31 = vpop.permute.xlu0 %1453 }
0x1242   :  { %v1459_v32 = vsel %vm335_vm4, %v1454_v31, 0 }
0x1243   :  { %2377 = vmatpush3.bf16.msra.mxu1 %v1459_v32 }
0x1244   :  { %v2512_v57 = vpop.eup %2511  ;;  %2388 = vmatprep.subr.bf16.mxu1 %v2531_v15 }
0x1245   :  { %v1448_v58 = vmul.f32 %v2512_v57, %v2508_v53  ;;  %v2459_v57 = vld [vmem:[%s3075_s12 + $0x20] sm:$0xff]  }
0x1247   :  { %v1451_v59 = vpack.c.bf16 %v1448_v58, %v1448_v58  ;;  %v2460_v58 = vld [vmem:[%s3075_s12 + $0x28] sm:$0xff]  }
0x1248   :  { %v2514_v60 = vpop.eup %2513 }
0x1249   :  { %v1450_v61 = vmul.f32 %v2514_v60, %v2510_v54  ;;  %2379 = vmatmul.mubr.msk.bf16.vlgmr.msra.gmra.mrb[40].mxu1 %vm305_vm3, %v1451_v59  ;;  %v2461_v59 = vld [vmem:[%s3075_s12 + $0x30] sm:$0xff]   ;;  %v2462_v60 = vld [vmem:[%s3075_s12 + $0x38] sm:$0xff]  }
0x124a   :  { %2390 = vmatprep.mubr.msk.bf16.mxu1 %vm2532_vm1, %v2531_v15  ;;  %2389 = vmatpush3.bf16.msra.mxu1 %v2456_v63 }
0x124b   :  { %v1452_v62 = vpack.c.bf16 %v1450_v61, %v1450_v61  ;;  %2400 = vmatprep.subr.bf16.mxu1 %v2531_v15  ;;  %v2145_v61 = vld [vmem:[%s3076_s11 + $0x1] ss:$0 sm:$0xff] }
0x124d   :  { %2385 = vmatmul.mubr.msk.bf16.vlgmr.msra.gmra.mrb[40].mxu0 %vm305_vm3, %v1452_v62 }
0x124e   :  { %2395 = vmatpush3.bf16.msra.mxu0 %v2455_v24  ;;  %2396 = vmatprep.mubr.msk.bf16.mxu0 %vm2532_vm1, %v2531_v15 }
0x124f   :  { %2408 = vmatprep.subr.bf16.mxu0 %v2531_v15 }
0x1255   :  { %2397 = vmatmul.mubr.msk.bf16.vlgmr.msra.gmra.mrb[44].mxu0 %vm193_vm2, %v1324_v19 }
0x1256   :  { %2416 = vmatprep.mubr.msk.bf16.mxu0 %vm2532_vm1, %v2531_v15  ;;  %2409 = vmatpush3.bf16.msra.mxu0 %v2459_v57 }
0x1257   :  { %2410 = vmatprep.subr.bf16.mxu0 %v2531_v15 }
0x125a   :  { %2411 = vmatpush3.bf16.msra.mxu0 %v2460_v58 }
0x125b   :  { %2412 = vmatprep.subr.bf16.mxu0 %v2531_v15 }
0x125e   :  { %2413 = vmatpush3.bf16.msra.mxu0 %v2461_v59  ;;  %v2167_v59 = vld [vmem:[%s3079_s15 + $0x1] ss:$0 sm:$0xff] }
0x125f   :  { %2414 = vmatprep.subr.bf16.mxu0 %v2531_v15 }
0x1262   :  { %2415 = vmatpush3.bf16.msra.mxu0 %v2462_v60 }
0x131c   :  { %v1495_v0 = vpop.f32.mrb[40].mxu1 }
0x131d   :  { %v2380_v1 = vpop.f32.mrb[41].mxu1 }
0x131e   :  { %v1498_v2 = vpop.f32.mrb[42].mxu1 }
0x131f   :  { %v2381_v3 = vpop.f32.mrb[43].mxu1 }
0x1320   :  { %v1543_v42 = vpop.f32.mrb[40].mxu0 }
0x1321   :  { %v1549_v4 = vpack.c.bf16 %v1543_v42, %v1495_v0  ;;  %v2386_v5 = vpop.f32.mrb[41].mxu0 }
0x1322   :  { %v1546_v6 = vpop.f32.mrb[42].mxu0 }
0x1323   :  { %v2387_v7 = vpop.f32.mrb[43].mxu0  ;;  %2391 = vmatmul.mubr.msk.bf16.vlgmr.msra.gmra.mrb[44].mxu1 %vm193_vm2, %v1549_v4 }
0x1324   :  { %2404 = vmatprep.mubr.msk.bf16.mxu1 %vm2532_vm1, %v2531_v15 }
0x1328   :  { %v1643_v8 = vpop.f32.mrb[44].mxu0 }
0x1329   :  { %v2398_v9 = vpop.f32.mrb[45].mxu0 }
0x132a   :  { %v1646_v10 = vpop.f32.mrb[46].mxu0 }
0x132b   :  { %v2399_v11 = vpop.f32.mrb[47].mxu0 }
0x13f6   :  { %v1593_v12 = vpop.f32.mrb[44].mxu1 }
0x13f7   :  { %v1644_v13 = vadd.f32 %v1643_v8, %v1593_v12  ;;  %v2392_v14 = vpop.f32.mrb[45].mxu1 }
0x13f8   :  { %v1596_v18 = vpop.f32.mrb[46].mxu1 }
0x13f9   :  { %v1658_v19 = vadd.f32 %v2135_v39, %v1644_v13  ;;  %v1647_v20 = vadd.f32 %v1646_v10, %v1596_v18  ;;  %v2393_v21 = vpop.f32.mrb[47].mxu1 }
0x13fb   :  { %v1659_v22 = vadd.f32 %v2135_v39, %v1647_v20  ;;  %v1660_v23 = vadd.f32 %v1658_v19, %v2865_v16 }
0x13fd   :  { %v1666_v25 = vsel %vm70_vm0, %v1660_v23, 0.0  ;;  %v1661_v26 = vadd.f32 %v1659_v22, %v2867_v17  ;;  %v2457_v17 = vld [vmem:[%s3072_s10 + $0x10] sm:$0xff]  }
0x13fe   :  { %1667 = vadd.xlane.f32.xlu1 %v1666_v25  ;;  %2401 = vmatpush3.bf16.msra.mxu1 %v2457_v17 }
0x13ff   :  { %v1669_v28 = vsel %vm70_vm0, %v1661_v26, 0.0  ;;  %2402 = vmatprep.subr.bf16.mxu1 %v2531_v15 }
0x1400   :  { %1670 = vadd.xlane.f32.xlu0 %v1669_v28 }
0x1402   :  { %2403 = vmatpush3.bf16.msra.mxu1 %v2458_v41 }
0x1403   :  { %2420 = vmatprep.subr.bf16.mxu1 %v2531_v15 }
0x148b   :  { %v1668_v29 = vpop.xlane.xlu1 %1667 }
0x148c   :  { %v1672_v30 = vmul.f32 0.03125, %v1668_v29 }
0x148d   :  { %v1671_v33 = vpop.xlane.xlu0 %1670 }
0x148e   :  { %v1674_v34 = vsub.f32 %v1660_v23, %v1672_v30  ;;  %v1673_v35 = vmul.f32 0.03125, %v1671_v33  ;;  %v2158_v23 = vld [vmem:[%s3077_s13 + $0x1] ss:$0 sm:$0xff] }
0x1490   :  { %v1675_v36 = vsub.f32 %v1661_v26, %v1673_v35  ;;  %v1676_v37 = vmul.f32 %v1674_v34, %v1674_v34 }
0x1492   :  { %v1678_v38 = vsel %vm70_vm0, %v1676_v37, 0.0  ;;  %v1677_v40 = vmul.f32 %v1675_v36, %v1675_v36 }
0x1493   :  { %1679 = vadd.xlane.f32.xlu0 %v1678_v38 }
0x1494   :  { %v1681_v16 = vsel %vm70_vm0, %v1677_v40, 0.0 }
0x1495   :  { %1682 = vadd.xlane.f32.xlu1 %v1681_v16 }
0x1520   :  { %v1680_v43 = vpop.xlane.xlu0 %1679 }
0x1521   :  { %v1684_v44 = vmul.f32 0.03125, %v1680_v43 }
0x1522   :  { %v1683_v45 = vpop.xlane.xlu1 %1682 }
0x1523   :  { %v1686_v46 = vadd.f32 1e-12, %v1684_v44  ;;  %v1685_v47 = vmul.f32 0.03125, %v1683_v45 }
0x1525   :  { %2515 = vrsqrt.f32 %v1686_v46  ;;  %v1687_v49 = vadd.f32 1e-12, %v1685_v47 }
0x1527   :  { %2517 = vrsqrt.f32 %v1687_v49  ;;  %v2463_v49 = vld [vmem:[%s3080_s16] sm:$0xff]  }
0x152f   :  { %v2516_v48 = vpop.eup %2515 }
0x1530   :  { %v1690_v51 = vmul.f32 %v2516_v48, %v1674_v34  ;;  %v2464_v48 = vld [vmem:[%s3080_s16 + $0x8] sm:$0xff]  }
0x1531   :  { %v2518_v53 = vpop.eup %2517 }
0x1532   :  { %v1698_v52 = vmul.f32 %v2138_v50, %v1690_v51  ;;  %v1691_v54 = vmul.f32 %v2518_v53, %v1675_v36 }
0x1534   :  { %v1699_v55 = vmul.f32 %v2138_v50, %v1691_v54  ;;  %v1706_v56 = vadd.f32 %v2139_v27, %v1698_v52 }
0x1536   :  { %v1707_v31 = vadd.f32 %v2139_v27, %v1699_v55 }
0x1538   :  { %v1713_v32 = vpack.c.bf16 %v1707_v31, %v1706_v56 }
0x153a   :  { %2405 = vmatmul.mubr.msk.bf16.vlgmr.msra.gmra.mrb[48].mxu1 %vm70_vm0, %v1713_v32 }
0x153b   :  { %2424 = vmatprep.mubr.msk.bf16.mxu1 %vm2532_vm1, %v2531_v15  ;;  %2421 = vmatpush3.bf16.msra.mxu1 %v2463_v49 }
0x153c   :  { %2422 = vmatprep.subr.bf16.mxu1 %v2531_v15 }
0x153f   :  { %2423 = vmatpush3.bf16.msra.mxu1 %v2464_v48 }
0x1540   :  { %2428 = vmatprep.subr.bf16.mxu1 %v2531_v15 }
0x160d   :  { %v1771_v24 = vpop.f32.mrb[48].mxu1 }
0x160e   :  { %v1772_v62 = vadd.f32 %v2145_v61, %v1771_v24  ;;  %v2406_v63 = vpop.f32.mrb[49].mxu1 }
0x160f   :  { %v1774_v0 = vpop.f32.mrb[50].mxu1  ;;  %v2465_v63 = vld [vmem:[%s3081_s18] sm:$0xff]  }
0x1610   :  { %v1778_v1 = vmul.f32 %v1772_v62, %v1772_v62  ;;  %v1775_v2 = vadd.f32 %v2145_v61, %v1774_v0  ;;  %v2407_v3 = vpop.f32.mrb[51].mxu1  ;;  %v2466_v0 = vld [vmem:[%s3081_s18 + $0x8] sm:$0xff]  }
0x1612   :  { %v1780_v42 = vmul.f32 %v1778_v1, %v1772_v62  ;;  %v1779_v4 = vmul.f32 %v1775_v2, %v1775_v2  ;;  %v2168_v1 = vld [vmem:[%s3082_s17] ss:$0 sm:$0xff] }
0x1614   :  { %v1782_v5 = vmul.f32 0.044715, %v1780_v42  ;;  %v1781_v6 = vmul.f32 %v1779_v4, %v1775_v2 }
0x1616   :  { %v1784_v7 = vadd.f32 %v1782_v5, %v1772_v62  ;;  %v1783_v8 = vmul.f32 0.044715, %v1781_v6 }
0x1618   :  { %v1786_v9 = vmul.f32 0.7978846, %v1784_v7  ;;  %v1785_v10 = vadd.f32 %v1783_v8, %v1775_v2 }
0x161a   :  { %2519 = vtanh.f32 %v1786_v9  ;;  %v1787_v11 = vmul.f32 0.7978846, %v1785_v10 }
0x161c   :  { %2521 = vtanh.f32 %v1787_v11 }
0x1624   :  { %v2520_v12 = vpop.eup %2519 }
0x1625   :  { %v1790_v39 = vadd.f32 1.0, %v2520_v12 }
0x1626   :  { %v2522_v13 = vpop.eup %2521 }
0x1627   :  { %v1792_v14 = vmul.f32 0.5, %v1790_v39  ;;  %v1791_v18 = vadd.f32 1.0, %v2522_v13 }
0x1629   :  { %v1793_v19 = vmul.f32 0.5, %v1791_v18  ;;  %v1794_v20 = vmul.f32 %v1792_v14, %v1772_v62 }
0x162b   :  { %v1795_v21 = vmul.f32 %v1793_v19, %v1775_v2 }
0x162d   :  { %v1805_v22 = vpack.c.bf16 %v1795_v21, %v1794_v20 }
0x162f   :  { %2417 = vmatmul.mubr.msk.bf16.vlgmr.msra.gmra.mrb[48].mxu0 %vm934_vm5, %v1805_v22 }
0x1702   :  { %v1875_v25 = vpop.f32.mrb[48].mxu0 }
0x1703   :  { %v1876_v26 = vadd.f32 %v2158_v23, %v1875_v25  ;;  %v2418_v28 = vpop.f32.mrb[49].mxu0 }
0x1704   :  { %v1878_v29 = vpop.f32.mrb[50].mxu0 }
0x1705   :  { %v1879_v30 = vadd.f32 %v2158_v23, %v1878_v29  ;;  %v2419_v33 = vpop.f32.mrb[51].mxu0  ;;  %v1882_v34 = vadd.f32 %v1876_v26, %v1706_v56  ;;  %v2166_v56 = vld [vmem:[%s3078_s14 + $0x1] ss:$0 sm:$0xff] }
0x1707   :  { %v1888_v35 = vsel %vm70_vm0, %v1882_v34, 0.0  ;;  %v1883_v36 = vadd.f32 %v1879_v30, %v1707_v31 }
0x1708   :  { %1889 = vadd.xlane.f32.xlu0 %v1888_v35 }
0x1709   :  { %v1891_v37 = vsel %vm70_vm0, %v1883_v36, 0.0 }
0x170a   :  { %1892 = vadd.xlane.f32.xlu1 %v1891_v37 }
0x1795   :  { %v1890_v38 = vpop.xlane.xlu0 %1889 }
0x1796   :  { %v1894_v40 = vmul.f32 0.03125, %v1890_v38 }
0x1797   :  { %v1893_v16 = vpop.xlane.xlu1 %1892 }
0x1798   :  { %v1896_v17 = vsub.f32 %v1882_v34, %v1894_v40  ;;  %v1895_v41 = vmul.f32 0.03125, %v1893_v16 }
0x179a   :  { %v1897_v43 = vsub.f32 %v1883_v36, %v1895_v41  ;;  %v1898_v44 = vmul.f32 %v1896_v17, %v1896_v17 }
0x179c   :  { %v1900_v45 = vsel %vm70_vm0, %v1898_v44, 0.0  ;;  %v1899_v46 = vmul.f32 %v1897_v43, %v1897_v43 }
0x179d   :  { %1901 = vadd.xlane.f32.xlu0 %v1900_v45 }
0x179e   :  { %v1903_v47 = vsel %vm70_vm0, %v1899_v46, 0.0 }
0x179f   :  { %1904 = vadd.xlane.f32.xlu1 %v1903_v47 }
0x182a   :  { %v1902_v50 = vpop.xlane.xlu0 %1901 }
0x182b   :  { %v1906_v51 = vmul.f32 0.03125, %v1902_v50 }
0x182c   :  { %v1905_v53 = vpop.xlane.xlu1 %1904 }
0x182d   :  { %v1908_v52 = vadd.f32 1e-12, %v1906_v51  ;;  %v1907_v54 = vmul.f32 0.03125, %v1905_v53 }
0x182f   :  { %2523 = vrsqrt.f32 %v1908_v52  ;;  %v1909_v27 = vadd.f32 1e-12, %v1907_v54 }
0x1831   :  { %2525 = vrsqrt.f32 %v1909_v27 }
0x1839   :  { %v2524_v55 = vpop.eup %2523 }
0x183a   :  { %v1912_v31 = vmul.f32 %v2524_v55, %v1896_v17 }
0x183b   :  { %v2526_v32 = vpop.eup %2525 }
0x183c   :  { %v1920_v57 = vmul.f32 %v2166_v56, %v1912_v31  ;;  %v1913_v58 = vmul.f32 %v2526_v32, %v1897_v43 }
0x183e   :  { %v1921_v60 = vmul.f32 %v2166_v56, %v1913_v58  ;;  %v1928_v61 = vadd.f32 %v2167_v59, %v1920_v57 }
0x1840   :  { %v1929_v24 = vadd.f32 %v2167_v59, %v1921_v60 }
0x1842   :  { %v1934_v62 = vpack.c.bf16 %v1929_v24, %v1928_v61 }
0x1844   :  { %2425 = vmatmul.mubr.msk.bf16.vlgmr.msra.gmra.mrb[52].mxu1 %vm70_vm0, %v1934_v62 }
0x1845   :  { %2432 = vmatprep.mubr.msk.bf16.mxu1 %vm2532_vm1, %v2531_v15  ;;  %2429 = vmatpush3.bf16.msra.mxu1 %v2465_v63 }
0x1846   :  { %2430 = vmatprep.subr.bf16.mxu1 %v2531_v15  ;;  %v2172_v15 = vld [vmem:[%s3083_s19] ss:$0 sm:$0xff] }
0x1849   :  { %2431 = vmatpush3.bf16.msra.mxu1 %v2466_v0 }
0x1917   :  { %v1991_v2 = vpop.f32.mrb[52].mxu1 }
0x1918   :  { %v1992_v3 = vadd.f32 %v2168_v1, %v1991_v2  ;;  %v2426_v42 = vpop.f32.mrb[53].mxu1 }
0x1919   :  { %v1994_v4 = vpop.f32.mrb[54].mxu1 }
0x191a   :  { %v1995_v5 = vadd.f32 %v2168_v1, %v1994_v4  ;;  %v2427_v6 = vpop.f32.mrb[55].mxu1  ;;  %2527 = vtanh.f32 %v1992_v3 }
0x191c   :  { %2529 = vtanh.f32 %v1995_v5 }
0x1924   :  { %v2528_v7 = vpop.eup %2527 }
0x1926   :  { %v2530_v8 = vpop.eup %2529 }
0x1927   :  { %v2004_v9 = vpack.c.bf16 %v2530_v8, %v2528_v7 }
0x1929   :  { %2433 = vmatmul.mubr.msk.bf16.vlgmr.msra.gmra.mrb[56].mxu1 %vm70_vm0, %v2004_v9 }
0x19fc   :  { %v2061_v10 = vpop.f32.mrb[56].mxu1 }
0x19fd   :  { %v2062_v11 = vadd.f32 %v2172_v15, %v2061_v10  ;;  %v2434_v12 = vpop.f32.mrb[57].mxu1 }
0x19fe   :  { %v2064_v39 = vpop.f32.mrb[58].mxu1 }
0x19ff   :  { %2068 = vst [vmem:[%s3084_s20] sm:$0xff] %v2062_v11  ;;  %v2065_v13 = vadd.f32 %v2172_v15, %v2064_v39  ;;  %v2435_v14 = vpop.f32.mrb[59].mxu1 }
0x1a01   :  { %2069 = vst [vmem:[%s3084_s20 + $0x8] sm:$0xff] %v2065_v13 }

</bundles_post_ra>
